<compile_context>
chip_gen: v5e
topology: v5e:2x2
jax: 0.10.0
libtpu: 0.0.40
codegen_flags: <defaults>
</compile_context>

<pallas_src>
import functools

import numpy as np
import jax
import jax.numpy as jnp
from jax.experimental import pallas as pl
from jax.experimental.pallas import tpu as pltpu


# --------------------------------------------------------------------------
# Fused Pallas kernel: spatial conv + multi-head attention + output projection
# --------------------------------------------------------------------------
def _fused_kernel(H, W, ks, dk, dv, num_heads,
                  xq_ref, xpe_ref, wconv_ref, bconv_ref,
                  wqkv_ref, bqkv_ref, wattn_ref, battn_ref, o_ref):
    """One batch element.

    xq_ref   : (1, ks, (H+2p)*W, Cin)  width-shifted padded input (channels-last)
    xpe_ref  : (1, HW, Cin)            x + positional encoding (channels-last)
    wconv_ref: (ks*ks, Cin, Nc)        spatial conv weights per (p, q) tap
    bconv_ref: (1, Nc)
    wqkv_ref : (Cin, 2*dk+dv)          fused QKV 1x1 weights (scale folded in Q)
    bqkv_ref : (1, 2*dk+dv)
    wattn_ref: (dv, dv)                conv_attn 1x1 weight (transposed)
    battn_ref: (1, dv)
    o_ref    : (1, HW, output_dim)     [conv_out | attn_out] channels-last
    """
    HW = H * W
    dkh = dk // num_heads
    dvh = dv // num_heads
    nc = wconv_ref.shape[-1]

    # ---- spatial conv path: ks*ks shifted 1x1 matmuls, register-accumulated
    acc = jnp.zeros((HW, nc), dtype=jnp.float32)
    for q in range(ks):
        for p in range(ks):
            # height shift p is a sublane-aligned slice of the flattened
            # (H+2p, W) spatial dim (offset p*W); width shift q was done on
            # the host (cheap, channels-last, only ks copies).
            xs = xq_ref[0, q, p * W:(p + H) * W, :]              # [HW, Cin]
            acc = acc + jnp.dot(xs, wconv_ref[p * ks + q],
                                preferred_element_type=jnp.float32)
    conv_out = acc + bconv_ref[...]                               # [HW, Nc]

    # ---- attention path: one fused QKV projection for all heads ------------
    x = xpe_ref[0]                                                # [HW, Cin]
    qkv = jnp.dot(x, wqkv_ref[...],
                  preferred_element_type=jnp.float32) + bqkv_ref[...]

    head_outs = []
    for h in range(num_heads):
        q_h = qkv[:, h * dkh:(h + 1) * dkh]                       # scale folded
        k_h = qkv[:, dk + h * dkh:dk + (h + 1) * dkh]
        v_h = qkv[:, 2 * dk + h * dvh:2 * dk + (h + 1) * dvh]

        # logits[l, m] = sum_d q[l, d] * k[m, d]
        logits = jax.lax.dot_general(q_h, k_h, (((1,), (1,)), ((), ())),
                                     preferred_element_type=jnp.float32)
        m = jnp.max(logits, axis=-1, keepdims=True)
        e = jnp.exp(logits - m)
        s = jnp.sum(e, axis=-1, keepdims=True)
        w = e * pl.reciprocal(s, approx=True)                     # softmax(-1)
        head_outs.append(jnp.dot(w, v_h,
                                 preferred_element_type=jnp.float32))  # [HW,dvh]

    attn_all = jnp.concatenate(head_outs, axis=-1)                # [HW, dv]
    attn_out = jnp.dot(attn_all, wattn_ref[...],
                       preferred_element_type=jnp.float32) + battn_ref[...]

    o_ref[0] = jnp.concatenate([conv_out, attn_out],
                               axis=-1).astype(o_ref.dtype)


# --------------------------------------------------------------------------
# Forward pass wrapper (NCHW in, NCHW out — PyTorch convention)
# --------------------------------------------------------------------------
def attention_conv2d_forward(x, params, pe, *, dk, dv, num_heads,
                             kernel_size, padding, output_dim):
    B, Cin, H, W = x.shape
    HW = H * W
    ks, pad = kernel_size, padding
    dkh = dk // num_heads
    nc = output_dim - dv
    Hp = H + 2 * pad

    # ---- layout prep (host glue, channels-last) ----------------------------
    x_nhwc = jnp.transpose(x, (0, 2, 3, 1))                       # [B,H,W,Cin]
    xpad = jnp.pad(x_nhwc, ((0, 0), (pad, pad), (pad, pad), (0, 0)))
    # width-shifted views, flattened over (Hp, W): ks copies, no transpose
    xq = jnp.stack([xpad[:, :, q:q + W, :] for q in range(ks)], axis=1)
    xq = xq.reshape(B, ks, Hp * W, Cin)

    pe_cl = jnp.transpose(pe, (1, 2, 0)).reshape(1, HW, Cin)
    xpe = x_nhwc.reshape(B, HW, Cin) + pe_cl                      # [B,HW,Cin]

    # ---- weight prep: [in, out] layout, attention scale folded into Q ------
    w_conv = jnp.transpose(params['conv_out_w'], (2, 3, 1, 0)).reshape(
        ks * ks, Cin, nc)
    b_conv = params['conv_out_b'].reshape(1, nc)

    scale = float(dkh) ** -0.5
    col_scale = jnp.concatenate([jnp.full((dk,), scale, jnp.float32),
                                 jnp.ones((dk + dv,), jnp.float32)])
    w_qkv = jnp.transpose(params['qkv_w']) * col_scale[None, :]   # [Cin, 2dk+dv]
    b_qkv = (params['qkv_b'] * col_scale).reshape(1, 2 * dk + dv)
    w_attn = jnp.transpose(params['attn_w'])                      # [dv, dv]
    b_attn = params['attn_b'].reshape(1, dv)

    kernel = functools.partial(_fused_kernel, H, W, ks, dk, dv, num_heads)

    out_cl = pl.pallas_call(
        kernel,
        out_shape=jax.ShapeDtypeStruct((B, HW, output_dim), jnp.float32),
        grid_spec=pltpu.PrefetchScalarGridSpec(
            num_scalar_prefetch=0,
            grid=(B,),
            in_specs=[
                pl.BlockSpec((1, ks, Hp * W, Cin), lambda b: (b, 0, 0, 0)),
                pl.BlockSpec((1, HW, Cin), lambda b: (b, 0, 0)),
                pl.BlockSpec((ks * ks, Cin, nc), lambda b: (0, 0, 0)),
                pl.BlockSpec((1, nc), lambda b: (0, 0)),
                pl.BlockSpec((Cin, 2 * dk + dv), lambda b: (0, 0)),
                pl.BlockSpec((1, 2 * dk + dv), lambda b: (0, 0)),
                pl.BlockSpec((dv, dv), lambda b: (0, 0)),
                pl.BlockSpec((1, dv), lambda b: (0, 0)),
            ],
            out_specs=pl.BlockSpec((1, HW, output_dim), lambda b: (b, 0, 0)),
        ),
        compiler_params=pltpu.CompilerParams(
            dimension_semantics=("parallel",),
            vmem_limit_bytes=32 * 1024 * 1024),
    )(xq, xpe, w_conv, b_conv, w_qkv, b_qkv, w_attn, b_attn)

    # channels-last -> NCHW
    return out_cl.reshape(B, H, W, output_dim).transpose(0, 3, 1, 2)


# --------------------------------------------------------------------------
# Positional encoding (exactly matches AttentionConv2d.compute_pe)
# --------------------------------------------------------------------------
def compute_pe(H, W, d, c=10000):
    P = np.zeros((H, W, d), dtype=np.float64)
    for i in range(H):
        for j in range(W):
            for k in range(int(d / 4)):
                denominator = np.power(c, 4 * k / d)
                P[i, j, 2 * k] = np.sin(i / denominator)
                P[i, j, 2 * k + 1] = np.cos(i / denominator)
                P[i, j, 2 * k + d // 2] = np.sin(j / denominator)
                P[i, j, 2 * k + 1 + d // 2] = np.cos(j / denominator)
    return jnp.asarray(P.astype(np.float32).transpose(2, 0, 1))   # [d, H, W]


# --------------------------------------------------------------------------
# Pure-JAX reference (mirrors the PyTorch forward for verification)
# --------------------------------------------------------------------------
def reference_forward(x, params, pe, *, dk, dv, num_heads, kernel_size,
                      padding, output_dim):
    pad = padding
    conv_out = jax.lax.conv_general_dilated(
        x, params['conv_out_w'], window_strides=(1, 1),
        padding=[(pad, pad), (pad, pad)],
        dimension_numbers=('NCHW', 'OIHW', 'NCHW'))
    conv_out = conv_out + params['conv_out_b'][None, :, None, None]

    xin = x + pe[None]
    qkv = jnp.einsum('oc,bchw->bohw', params['qkv_w'], xin)
    qkv = qkv + params['qkv_b'][None, :, None, None]
    q, k, v = qkv[:, :dk], qkv[:, dk:2 * dk], qkv[:, 2 * dk:]
    B, _, H, W = q.shape
    dkh = dk // num_heads
    q = q.reshape(B, num_heads, dkh, H * W) * (dkh ** -0.5)
    k = k.reshape(B, num_heads, dkh, H * W)
    v = v.reshape(B, num_heads, dv // num_heads, H * W)
    logits = jnp.einsum('ijkl,ijkm->ijlm', q, k)
    weights = jax.nn.softmax(logits, axis=-1)
    attn = jnp.einsum('ijkl,ijfl->ijfk', weights, v)
    attn = attn.reshape(B, dv, H, W)
    attn = jnp.einsum('oc,bchw->bohw', params['attn_w'], attn)
    attn = attn + params['attn_b'][None, :, None, None]
    return jnp.concatenate([conv_out, attn], axis=1)


# --------------------------------------------------------------------------
if __name__ == "__main__":
    # Small, deterministic configuration.
    B, Cin, H, W = 2, 4, 8, 8
    output_dim, dk, dv, num_heads = 8, 8, 4, 2
    kernel_size, padding = 3, 1

    key = jax.random.PRNGKey(0)
    keys = jax.random.split(key, 8)
    x = jax.random.normal(keys[0], (B, Cin, H, W), jnp.float32)

    params = {
        # conv_qkv: Conv2d(Cin, 2*dk+dv, 1) -> weight [2dk+dv, Cin], bias [2dk+dv]
        'qkv_w': 0.1 * jax.random.normal(keys[1], (2 * dk + dv, Cin), jnp.float32),
        'qkv_b': 0.01 * jax.random.normal(keys[2], (2 * dk + dv,), jnp.float32),
        # conv_attn: Conv2d(dv, dv, 1) -> weight [dv, dv], bias [dv]
        'attn_w': 0.1 * jax.random.normal(keys[3], (dv, dv), jnp.float32),
        'attn_b': 0.01 * jax.random.normal(keys[4], (dv,), jnp.float32),
        # conv_out: Conv2d(Cin, output_dim - dv, ks, padding)
        'conv_out_w': 0.1 * jax.random.normal(
            keys[5], (output_dim - dv, Cin, kernel_size, kernel_size), jnp.float32),
        'conv_out_b': 0.01 * jax.random.normal(keys[6], (output_dim - dv,), jnp.float32),
    }

    pe = compute_pe(H, W, Cin)

    cfg = dict(dk=dk, dv=dv, num_heads=num_heads, kernel_size=kernel_size,
               padding=padding, output_dim=output_dim)

    out = attention_conv2d_forward(x, params, pe, **cfg)
    out = jax.block_until_ready(out)

    ref = jax.block_until_ready(reference_forward(x, params, pe, **cfg))

    assert out.shape == (B, output_dim, H, W), out.shape
    # approx reciprocal in the softmax -> slightly looser tolerance than exact-f32
    np.testing.assert_allclose(np.asarray(out), np.asarray(ref),
                               atol=2e-3, rtol=2e-3)
    print("KERNEL_OK")
</pallas_src>

<mosaic_0001>
module attributes {stable_mosaic.version = 11 : i64} {
  func.func @_fused_kernel(%arg0: i32, %arg1: memref<1x3x80x4xf32, #tpu.memory_space<vmem>>, %arg2: memref<1x64x4xf32, #tpu.memory_space<vmem>>, %arg3: memref<9x4x4xf32, #tpu.memory_space<vmem>>, %arg4: memref<1x4xf32, #tpu.memory_space<vmem>>, %arg5: memref<4x20xf32, #tpu.memory_space<vmem>>, %arg6: memref<1x20xf32, #tpu.memory_space<vmem>>, %arg7: memref<4x4xf32, #tpu.memory_space<vmem>>, %arg8: memref<1x4xf32, #tpu.memory_space<vmem>>, %arg9: memref<1x64x8xf32, #tpu.memory_space<vmem>>) attributes {dimension_semantics = [#tpu.dimension_semantics<parallel>], iteration_bounds = array<i64: 2>, scalar_prefetch = 0 : i64, scratch_operands = 0 : i64, tpu.core_type = #tpu.core_type<tc>, window_params = [{transform_indices = @transform_0, window_bounds = array<i64: 1, 3, 80, 4>}, {transform_indices = @transform_1, window_bounds = array<i64: 1, 64, 4>}, {pipeline_mode = #tpu.pipeline_mode<synchronous>, transform_indices = @transform_2, window_bounds = array<i64: 9, 4, 4>}, {pipeline_mode = #tpu.pipeline_mode<synchronous>, transform_indices = @transform_3, window_bounds = array<i64: 1, 4>}, {pipeline_mode = #tpu.pipeline_mode<synchronous>, transform_indices = @transform_4, window_bounds = array<i64: 4, 20>}, {pipeline_mode = #tpu.pipeline_mode<synchronous>, transform_indices = @transform_5, window_bounds = array<i64: 1, 20>}, {pipeline_mode = #tpu.pipeline_mode<synchronous>, transform_indices = @transform_6, window_bounds = array<i64: 4, 4>}, {pipeline_mode = #tpu.pipeline_mode<synchronous>, transform_indices = @transform_7, window_bounds = array<i64: 1, 4>}, {transform_indices = @transform_8, window_bounds = array<i64: 1, 64, 8>}]} {
    %cst = arith.constant 0.000000e+00 : f32
    %0 = vector.broadcast %cst : f32 to vector<64x4xf32>
    %c0 = arith.constant 0 : index
    %c0_0 = arith.constant 0 : index
    %c0_1 = arith.constant 0 : index
    %c0_2 = arith.constant 0 : index
    %1 = vector.load %arg1[%c0, %c0_0, %c0_1, %c0_2] : memref<1x3x80x4xf32, #tpu.memory_space<vmem>>, vector<1x1x64x4xf32>
    %2 = vector.shape_cast %1 : vector<1x1x64x4xf32> to vector<64x4xf32>
    %c0_3 = arith.constant 0 : index
    %c0_4 = arith.constant 0 : index
    %c0_5 = arith.constant 0 : index
    %3 = vector.load %arg3[%c0_3, %c0_4, %c0_5] : memref<9x4x4xf32, #tpu.memory_space<vmem>>, vector<1x4x4xf32>
    %4 = vector.shape_cast %3 : vector<1x4x4xf32> to vector<4x4xf32>
    %cst_6 = arith.constant dense<0.000000e+00> : vector<64x4xf32>
    %5 = tpu.matmul %2, %4, %cst_6 {dimension_numbers = #tpu.dot_dimension_numbers<[1], [0], [0], [1], [0, 0, 1, 1], [], []>} : vector<64x4xf32>, vector<4x4xf32>, vector<64x4xf32> -> vector<64x4xf32>
    %6 = arith.addf %0, %5 : vector<64x4xf32>
    %c0_7 = arith.constant 0 : index
    %c0_8 = arith.constant 0 : index
    %c8 = arith.constant 8 : index
    %c0_9 = arith.constant 0 : index
    %7 = vector.load %arg1[%c0_7, %c0_8, %c8, %c0_9] : memref<1x3x80x4xf32, #tpu.memory_space<vmem>>, vector<1x1x64x4xf32>
    %8 = vector.shape_cast %7 : vector<1x1x64x4xf32> to vector<64x4xf32>
    %c3 = arith.constant 3 : index
    %c0_10 = arith.constant 0 : index
    %c0_11 = arith.constant 0 : index
    %9 = vector.load %arg3[%c3, %c0_10, %c0_11] : memref<9x4x4xf32, #tpu.memory_space<vmem>>, vector<1x4x4xf32>
    %10 = vector.shape_cast %9 : vector<1x4x4xf32> to vector<4x4xf32>
    %cst_12 = arith.constant dense<0.000000e+00> : vector<64x4xf32>
    %11 = tpu.matmul %8, %10, %cst_12 {dimension_numbers = #tpu.dot_dimension_numbers<[1], [0], [0], [1], [0, 0, 1, 1], [], []>} : vector<64x4xf32>, vector<4x4xf32>, vector<64x4xf32> -> vector<64x4xf32>
    %12 = arith.addf %6, %11 : vector<64x4xf32>
    %c0_13 = arith.constant 0 : index
    %c0_14 = arith.constant 0 : index
    %c16 = arith.constant 16 : index
    %c0_15 = arith.constant 0 : index
    %13 = vector.load %arg1[%c0_13, %c0_14, %c16, %c0_15] : memref<1x3x80x4xf32, #tpu.memory_space<vmem>>, vector<1x1x64x4xf32>
    %14 = vector.shape_cast %13 : vector<1x1x64x4xf32> to vector<64x4xf32>
    %c6 = arith.constant 6 : index
    %c0_16 = arith.constant 0 : index
    %c0_17 = arith.constant 0 : index
    %15 = vector.load %arg3[%c6, %c0_16, %c0_17] : memref<9x4x4xf32, #tpu.memory_space<vmem>>, vector<1x4x4xf32>
    %16 = vector.shape_cast %15 : vector<1x4x4xf32> to vector<4x4xf32>
    %cst_18 = arith.constant dense<0.000000e+00> : vector<64x4xf32>
    %17 = tpu.matmul %14, %16, %cst_18 {dimension_numbers = #tpu.dot_dimension_numbers<[1], [0], [0], [1], [0, 0, 1, 1], [], []>} : vector<64x4xf32>, vector<4x4xf32>, vector<64x4xf32> -> vector<64x4xf32>
    %18 = arith.addf %12, %17 : vector<64x4xf32>
    %c0_19 = arith.constant 0 : index
    %c1 = arith.constant 1 : index
    %c0_20 = arith.constant 0 : index
    %c0_21 = arith.constant 0 : index
    %19 = vector.load %arg1[%c0_19, %c1, %c0_20, %c0_21] : memref<1x3x80x4xf32, #tpu.memory_space<vmem>>, vector<1x1x64x4xf32>
    %20 = vector.shape_cast %19 : vector<1x1x64x4xf32> to vector<64x4xf32>
    %c1_22 = arith.constant 1 : index
    %c0_23 = arith.constant 0 : index
    %c0_24 = arith.constant 0 : index
    %21 = vector.load %arg3[%c1_22, %c0_23, %c0_24] : memref<9x4x4xf32, #tpu.memory_space<vmem>>, vector<1x4x4xf32>
    %22 = vector.shape_cast %21 : vector<1x4x4xf32> to vector<4x4xf32>
    %cst_25 = arith.constant dense<0.000000e+00> : vector<64x4xf32>
    %23 = tpu.matmul %20, %22, %cst_25 {dimension_numbers = #tpu.dot_dimension_numbers<[1], [0], [0], [1], [0, 0, 1, 1], [], []>} : vector<64x4xf32>, vector<4x4xf32>, vector<64x4xf32> -> vector<64x4xf32>
    %24 = arith.addf %18, %23 : vector<64x4xf32>
    %c0_26 = arith.constant 0 : index
    %c1_27 = arith.constant 1 : index
    %c8_28 = arith.constant 8 : index
    %c0_29 = arith.constant 0 : index
    %25 = vector.load %arg1[%c0_26, %c1_27, %c8_28, %c0_29] : memref<1x3x80x4xf32, #tpu.memory_space<vmem>>, vector<1x1x64x4xf32>
    %26 = vector.shape_cast %25 : vector<1x1x64x4xf32> to vector<64x4xf32>
    %c4 = arith.constant 4 : index
    %c0_30 = arith.constant 0 : index
    %c0_31 = arith.constant 0 : index
    %27 = vector.load %arg3[%c4, %c0_30, %c0_31] : memref<9x4x4xf32, #tpu.memory_space<vmem>>, vector<1x4x4xf32>
    %28 = vector.shape_cast %27 : vector<1x4x4xf32> to vector<4x4xf32>
    %cst_32 = arith.constant dense<0.000000e+00> : vector<64x4xf32>
    %29 = tpu.matmul %26, %28, %cst_32 {dimension_numbers = #tpu.dot_dimension_numbers<[1], [0], [0], [1], [0, 0, 1, 1], [], []>} : vector<64x4xf32>, vector<4x4xf32>, vector<64x4xf32> -> vector<64x4xf32>
    %30 = arith.addf %24, %29 : vector<64x4xf32>
    %c0_33 = arith.constant 0 : index
    %c1_34 = arith.constant 1 : index
    %c16_35 = arith.constant 16 : index
    %c0_36 = arith.constant 0 : index
    %31 = vector.load %arg1[%c0_33, %c1_34, %c16_35, %c0_36] : memref<1x3x80x4xf32, #tpu.memory_space<vmem>>, vector<1x1x64x4xf32>
    %32 = vector.shape_cast %31 : vector<1x1x64x4xf32> to vector<64x4xf32>
    %c7 = arith.constant 7 : index
    %c0_37 = arith.constant 0 : index
    %c0_38 = arith.constant 0 : index
    %33 = vector.load %arg3[%c7, %c0_37, %c0_38] : memref<9x4x4xf32, #tpu.memory_space<vmem>>, vector<1x4x4xf32>
    %34 = vector.shape_cast %33 : vector<1x4x4xf32> to vector<4x4xf32>
    %cst_39 = arith.constant dense<0.000000e+00> : vector<64x4xf32>
    %35 = tpu.matmul %32, %34, %cst_39 {dimension_numbers = #tpu.dot_dimension_numbers<[1], [0], [0], [1], [0, 0, 1, 1], [], []>} : vector<64x4xf32>, vector<4x4xf32>, vector<64x4xf32> -> vector<64x4xf32>
    %36 = arith.addf %30, %35 : vector<64x4xf32>
    %c0_40 = arith.constant 0 : index
    %c2 = arith.constant 2 : index
    %c0_41 = arith.constant 0 : index
    %c0_42 = arith.constant 0 : index
    %37 = vector.load %arg1[%c0_40, %c2, %c0_41, %c0_42] : memref<1x3x80x4xf32, #tpu.memory_space<vmem>>, vector<1x1x64x4xf32>
    %38 = vector.shape_cast %37 : vector<1x1x64x4xf32> to vector<64x4xf32>
    %c2_43 = arith.constant 2 : index
    %c0_44 = arith.constant 0 : index
    %c0_45 = arith.constant 0 : index
    %39 = vector.load %arg3[%c2_43, %c0_44, %c0_45] : memref<9x4x4xf32, #tpu.memory_space<vmem>>, vector<1x4x4xf32>
    %40 = vector.shape_cast %39 : vector<1x4x4xf32> to vector<4x4xf32>
    %cst_46 = arith.constant dense<0.000000e+00> : vector<64x4xf32>
    %41 = tpu.matmul %38, %40, %cst_46 {dimension_numbers = #tpu.dot_dimension_numbers<[1], [0], [0], [1], [0, 0, 1, 1], [], []>} : vector<64x4xf32>, vector<4x4xf32>, vector<64x4xf32> -> vector<64x4xf32>
    %42 = arith.addf %36, %41 : vector<64x4xf32>
    %c0_47 = arith.constant 0 : index
    %c2_48 = arith.constant 2 : index
    %c8_49 = arith.constant 8 : index
    %c0_50 = arith.constant 0 : index
    %43 = vector.load %arg1[%c0_47, %c2_48, %c8_49, %c0_50] : memref<1x3x80x4xf32, #tpu.memory_space<vmem>>, vector<1x1x64x4xf32>
    %44 = vector.shape_cast %43 : vector<1x1x64x4xf32> to vector<64x4xf32>
    %c5 = arith.constant 5 : index
    %c0_51 = arith.constant 0 : index
    %c0_52 = arith.constant 0 : index
    %45 = vector.load %arg3[%c5, %c0_51, %c0_52] : memref<9x4x4xf32, #tpu.memory_space<vmem>>, vector<1x4x4xf32>
    %46 = vector.shape_cast %45 : vector<1x4x4xf32> to vector<4x4xf32>
    %cst_53 = arith.constant dense<0.000000e+00> : vector<64x4xf32>
    %47 = tpu.matmul %44, %46, %cst_53 {dimension_numbers = #tpu.dot_dimension_numbers<[1], [0], [0], [1], [0, 0, 1, 1], [], []>} : vector<64x4xf32>, vector<4x4xf32>, vector<64x4xf32> -> vector<64x4xf32>
    %48 = arith.addf %42, %47 : vector<64x4xf32>
    %c0_54 = arith.constant 0 : index
    %c2_55 = arith.constant 2 : index
    %c16_56 = arith.constant 16 : index
    %c0_57 = arith.constant 0 : index
    %49 = vector.load %arg1[%c0_54, %c2_55, %c16_56, %c0_57] : memref<1x3x80x4xf32, #tpu.memory_space<vmem>>, vector<1x1x64x4xf32>
    %50 = vector.shape_cast %49 : vector<1x1x64x4xf32> to vector<64x4xf32>
    %c8_58 = arith.constant 8 : index
    %c0_59 = arith.constant 0 : index
    %c0_60 = arith.constant 0 : index
    %51 = vector.load %arg3[%c8_58, %c0_59, %c0_60] : memref<9x4x4xf32, #tpu.memory_space<vmem>>, vector<1x4x4xf32>
    %52 = vector.shape_cast %51 : vector<1x4x4xf32> to vector<4x4xf32>
    %cst_61 = arith.constant dense<0.000000e+00> : vector<64x4xf32>
    %53 = tpu.matmul %50, %52, %cst_61 {dimension_numbers = #tpu.dot_dimension_numbers<[1], [0], [0], [1], [0, 0, 1, 1], [], []>} : vector<64x4xf32>, vector<4x4xf32>, vector<64x4xf32> -> vector<64x4xf32>
    %54 = arith.addf %48, %53 : vector<64x4xf32>
    %c0_62 = arith.constant 0 : index
    %c0_63 = arith.constant 0 : index
    %55 = vector.load %arg4[%c0_62, %c0_63] : memref<1x4xf32, #tpu.memory_space<vmem>>, vector<1x4xf32>
    %56 = vector.broadcast %55 : vector<1x4xf32> to vector<64x4xf32>
    %57 = arith.addf %54, %56 : vector<64x4xf32>
    %c0_64 = arith.constant 0 : index
    %c0_65 = arith.constant 0 : index
    %c0_66 = arith.constant 0 : index
    %58 = vector.load %arg2[%c0_64, %c0_65, %c0_66] : memref<1x64x4xf32, #tpu.memory_space<vmem>>, vector<1x64x4xf32>
    %59 = vector.shape_cast %58 : vector<1x64x4xf32> to vector<64x4xf32>
    %c0_67 = arith.constant 0 : index
    %c0_68 = arith.constant 0 : index
    %60 = vector.load %arg5[%c0_67, %c0_68] : memref<4x20xf32, #tpu.memory_space<vmem>>, vector<4x20xf32>
    %cst_69 = arith.constant dense<0.000000e+00> : vector<64x20xf32>
    %61 = tpu.matmul %59, %60, %cst_69 {dimension_numbers = #tpu.dot_dimension_numbers<[1], [0], [0], [1], [0, 0, 1, 1], [], []>} : vector<64x4xf32>, vector<4x20xf32>, vector<64x20xf32> -> vector<64x20xf32>
    %c0_70 = arith.constant 0 : index
    %c0_71 = arith.constant 0 : index
    %62 = vector.load %arg6[%c0_70, %c0_71] : memref<1x20xf32, #tpu.memory_space<vmem>>, vector<1x20xf32>
    %63 = vector.broadcast %62 : vector<1x20xf32> to vector<64x20xf32>
    %64 = arith.addf %61, %63 : vector<64x20xf32>
    %65 = vector.extract_strided_slice %64 {offsets = [0, 0], sizes = [64, 4], strides = [1, 1]} : vector<64x20xf32> to vector<64x4xf32>
    %66 = vector.extract_strided_slice %64 {offsets = [0, 8], sizes = [64, 4], strides = [1, 1]} : vector<64x20xf32> to vector<64x4xf32>
    %67 = vector.extract_strided_slice %64 {offsets = [0, 16], sizes = [64, 2], strides = [1, 1]} : vector<64x20xf32> to vector<64x2xf32>
    %cst_72 = arith.constant dense<0.000000e+00> : vector<64x64xf32>
    %68 = tpu.matmul %65, %66, %cst_72 {dimension_numbers = #tpu.dot_dimension_numbers<[1], [1], [0], [0], [0, 0, 1, 0], [], []>} : vector<64x4xf32>, vector<64x4xf32>, vector<64x64xf32> -> vector<64x64xf32>
    %cst_73 = arith.constant dense<0xFF800000> : vector<64xf32>
    %69 = vector.multi_reduction <maximumf>, %68, %cst_73 [1] : vector<64x64xf32> to vector<64xf32>
    %70 = vector.shape_cast %69 : vector<64xf32> to vector<64x1xf32>
    %71 = vector.broadcast %70 : vector<64x1xf32> to vector<64x64xf32>
    %72 = arith.subf %68, %71 : vector<64x64xf32>
    %73 = math.exp %72 : vector<64x64xf32>
    %cst_74 = arith.constant dense<0.000000e+00> : vector<64xf32>
    %74 = vector.multi_reduction <add>, %73, %cst_74 [1] : vector<64x64xf32> to vector<64xf32>
    %75 = vector.shape_cast %74 : vector<64xf32> to vector<64x1xf32>
    %76 = tpu.reciprocal %75 {approx = true} : vector<64x1xf32> -> vector<64x1xf32>
    %77 = vector.broadcast %76 : vector<64x1xf32> to vector<64x64xf32>
    %78 = arith.mulf %73, %77 : vector<64x64xf32>
    %cst_75 = arith.constant dense<0.000000e+00> : vector<64x2xf32>
    %79 = tpu.matmul %78, %67, %cst_75 {dimension_numbers = #tpu.dot_dimension_numbers<[1], [0], [0], [1], [0, 0, 1, 1], [], []>} : vector<64x64xf32>, vector<64x2xf32>, vector<64x2xf32> -> vector<64x2xf32>
    %80 = vector.extract_strided_slice %64 {offsets = [0, 4], sizes = [64, 4], strides = [1, 1]} : vector<64x20xf32> to vector<64x4xf32>
    %81 = vector.extract_strided_slice %64 {offsets = [0, 12], sizes = [64, 4], strides = [1, 1]} : vector<64x20xf32> to vector<64x4xf32>
    %82 = vector.extract_strided_slice %64 {offsets = [0, 18], sizes = [64, 2], strides = [1, 1]} : vector<64x20xf32> to vector<64x2xf32>
    %cst_76 = arith.constant dense<0.000000e+00> : vector<64x64xf32>
    %83 = tpu.matmul %80, %81, %cst_76 {dimension_numbers = #tpu.dot_dimension_numbers<[1], [1], [0], [0], [0, 0, 1, 0], [], []>} : vector<64x4xf32>, vector<64x4xf32>, vector<64x64xf32> -> vector<64x64xf32>
    %cst_77 = arith.constant dense<0xFF800000> : vector<64xf32>
    %84 = vector.multi_reduction <maximumf>, %83, %cst_77 [1] : vector<64x64xf32> to vector<64xf32>
    %85 = vector.shape_cast %84 : vector<64xf32> to vector<64x1xf32>
    %86 = vector.broadcast %85 : vector<64x1xf32> to vector<64x64xf32>
    %87 = arith.subf %83, %86 : vector<64x64xf32>
    %88 = math.exp %87 : vector<64x64xf32>
    %cst_78 = arith.constant dense<0.000000e+00> : vector<64xf32>
    %89 = vector.multi_reduction <add>, %88, %cst_78 [1] : vector<64x64xf32> to vector<64xf32>
    %90 = vector.shape_cast %89 : vector<64xf32> to vector<64x1xf32>
    %91 = tpu.reciprocal %90 {approx = true} : vector<64x1xf32> -> vector<64x1xf32>
    %92 = vector.broadcast %91 : vector<64x1xf32> to vector<64x64xf32>
    %93 = arith.mulf %88, %92 : vector<64x64xf32>
    %cst_79 = arith.constant dense<0.000000e+00> : vector<64x2xf32>
    %94 = tpu.matmul %93, %82, %cst_79 {dimension_numbers = #tpu.dot_dimension_numbers<[1], [0], [0], [1], [0, 0, 1, 1], [], []>} : vector<64x64xf32>, vector<64x2xf32>, vector<64x2xf32> -> vector<64x2xf32>
    %95 = tpu.concatenate %79, %94 in 1 : vector<64x2xf32>, vector<64x2xf32> -> vector<64x4xf32>
    %c0_80 = arith.constant 0 : index
    %c0_81 = arith.constant 0 : index
    %96 = vector.load %arg7[%c0_80, %c0_81] : memref<4x4xf32, #tpu.memory_space<vmem>>, vector<4x4xf32>
    %cst_82 = arith.constant dense<0.000000e+00> : vector<64x4xf32>
    %97 = tpu.matmul %95, %96, %cst_82 {dimension_numbers = #tpu.dot_dimension_numbers<[1], [0], [0], [1], [0, 0, 1, 1], [], []>} : vector<64x4xf32>, vector<4x4xf32>, vector<64x4xf32> -> vector<64x4xf32>
    %c0_83 = arith.constant 0 : index
    %c0_84 = arith.constant 0 : index
    %98 = vector.load %arg8[%c0_83, %c0_84] : memref<1x4xf32, #tpu.memory_space<vmem>>, vector<1x4xf32>
    %99 = vector.broadcast %98 : vector<1x4xf32> to vector<64x4xf32>
    %100 = arith.addf %97, %99 : vector<64x4xf32>
    %101 = tpu.concatenate %57, %100 in 1 : vector<64x4xf32>, vector<64x4xf32> -> vector<64x8xf32>
    %c0_85 = arith.constant 0 : index
    %c0_86 = arith.constant 0 : index
    %c0_87 = arith.constant 0 : index
    %102 = vector.load %arg9[%c0_85, %c0_86, %c0_87] : memref<1x64x8xf32, #tpu.memory_space<vmem>>, vector<1x64x8xf32>
    %103 = vector.shape_cast %102 : vector<1x64x8xf32> to vector<64x8xf32>
    %104 = vector.shape_cast %101 : vector<64x8xf32> to vector<1x64x8xf32>
    tpu.vector_store %arg9[%c0_85, %c0_86, %c0_87], %104 {strides = array<i32>} : memref<1x64x8xf32, #tpu.memory_space<vmem>>, vector<1x64x8xf32>,
    return
  }
  func.func @transform_0(%arg0: i32) -> (i32, i32, i32, i32) {
    %c0_i32 = arith.constant 0 : i32
    %c0_i32_0 = arith.constant 0 : i32
    %c0_i32_1 = arith.constant 0 : i32
    %c0_i32_2 = arith.constant 0 : i32
    return %arg0, %c0_i32, %c0_i32_0, %c0_i32_1 : i32, i32, i32, i32
  }
  func.func @transform_1(%arg0: i32) -> (i32, i32, i32) {
    %c0_i32 = arith.constant 0 : i32
    %c0_i32_0 = arith.constant 0 : i32
    %c0_i32_1 = arith.constant 0 : i32
    return %arg0, %c0_i32, %c0_i32_0 : i32, i32, i32
  }
  func.func @transform_2(%arg0: i32) -> (i32, i32, i32) {
    %c0_i32 = arith.constant 0 : i32
    %c0_i32_0 = arith.constant 0 : i32
    %c0_i32_1 = arith.constant 0 : i32
    %c0_i32_2 = arith.constant 0 : i32
    return %c0_i32, %c0_i32_0, %c0_i32_1 : i32, i32, i32
  }
  func.func @transform_3(%arg0: i32) -> (i32, i32) {
    %c0_i32 = arith.constant 0 : i32
    %c0_i32_0 = arith.constant 0 : i32
    %c0_i32_1 = arith.constant 0 : i32
    return %c0_i32, %c0_i32_0 : i32, i32
  }
  func.func @transform_4(%arg0: i32) -> (i32, i32) {
    %c0_i32 = arith.constant 0 : i32
    %c0_i32_0 = arith.constant 0 : i32
    %c0_i32_1 = arith.constant 0 : i32
    return %c0_i32, %c0_i32_0 : i32, i32
  }
  func.func @transform_5(%arg0: i32) -> (i32, i32) {
    %c0_i32 = arith.constant 0 : i32
    %c0_i32_0 = arith.constant 0 : i32
    %c0_i32_1 = arith.constant 0 : i32
    return %c0_i32, %c0_i32_0 : i32, i32
  }
  func.func @transform_6(%arg0: i32) -> (i32, i32) {
    %c0_i32 = arith.constant 0 : i32
    %c0_i32_0 = arith.constant 0 : i32
    %c0_i32_1 = arith.constant 0 : i32
    return %c0_i32, %c0_i32_0 : i32, i32
  }
  func.func @transform_7(%arg0: i32) -> (i32, i32) {
    %c0_i32 = arith.constant 0 : i32
    %c0_i32_0 = arith.constant 0 : i32
    %c0_i32_1 = arith.constant 0 : i32
    return %c0_i32, %c0_i32_0 : i32, i32
  }
  func.func @transform_8(%arg0: i32) -> (i32, i32, i32) {
    %c0_i32 = arith.constant 0 : i32
    %c0_i32_0 = arith.constant 0 : i32
    %c0_i32_1 = arith.constant 0 : i32
    return %arg0, %c0_i32, %c0_i32_0 : i32, i32, i32
  }
}

</mosaic_0001>

<bundles_post_ra>
// kernel: tpu_custom_call.1
= control target key start
LH: loop header
LB: loop body
LE: loop exit
PB: predicated region body
PF: predicated region fallthrough
CT: control target
= control target key end

     0   :  { %s2342_s27 = smov 0   ;;  %s2993_s0 = inlined_call_operand.vmem [shape: f32[2,3,80,4], index: 0, kind: input, shape index: {}]   ;;  %s2994_s1 = inlined_call_operand.vmem [shape: f32[2,64,4], index: 1, kind: input, shape index: {}]   ;;  %s2995_s2 = inlined_call_operand.vmem [shape: f32[9,4,4], index: 2, kind: input, shape index: {}]   ;;  %s2996_s3 = inlined_call_operand.vmem [shape: f32[1,4], index: 3, kind: input, shape index: {}]   ;;  %s2997_s4 = inlined_call_operand.vmem [shape: f32[4,20], index: 4, kind: input, shape index: {}]   ;;  %s2998_s5 = inlined_call_operand.vmem [shape: f32[1,20], index: 5, kind: input, shape index: {}]   ;;  %s2999_s6 = inlined_call_operand.vmem [shape: f32[4,4], index: 6, kind: input, shape index: {}]   ;;  %s3000_s7 = inlined_call_operand.vmem [shape: f32[1,4], index: 7, kind: input, shape index: {}]   ;;  %s3001_s8 = inlined_call_operand.vmem [shape: f32[2,64,8], index: 8, kind: output, shape index: {}]  }
   0x1 LB: > { %s1939_s28 = sadd.s32 4294967295, %s2288_s27   ;;  %p1943_p0 = scmp.ge.s32.totalorder %s2288_s27, 1  ;;  %s2288_s27 = sphi %s2342_s27, %s18_s27  }
   0x2   : > { %p272_p1 = scmp.lt.s32.totalorder %s2288_s27, 3 }
   0x4   : > { %p273_p2 = pnand %p1943_p0, %p272_p1 }
   0x5   : > { %p311_p3 = scmp.lt.s32.totalorder (!%p273_p2), %s1939_s28, 1  ;;  %s2292_s21 = smov (!%p273_p2), 124  }
   0x6   : > { %276 = sbr.rel (%p273_p2) target bundleno = 1447 (0x5a7), region = 52  ;;  %s2293_s22 = smov (!%p273_p2), 110  }
   0x7   : > { %s2294_s23 = smov (!%p273_p2), 112   ;;  %s2295_s24 = smov (!%p273_p2), 2  }
   0x8   : > { %s2296_s10 = smov (!%p273_p2), 4  }
   0xb   : > { %v1949_v0 = vld [vmem:[%s2995_s2 + $0xc] sm:$0xf]  ;;  %vm363_vm0 = vcmask 1043456   ;;  %v334_v1 = vld [vmem:[%s2995_s2] sm:$0xf]  ;;  %s3003_s28 = smov (!%p311_p3, %s1939_s28), 1 }
   0xc   : > { %1950 = vmatpush.msk.msra.mxu0 %vm363_vm0, %v1949_v0  ;;  %2156 = vmatpush.msk.msra.mxu1 %vm363_vm0, %v334_v1  ;;  %v1968_v2 = vld [vmem:[%s2995_s2 + $0x18] sm:$0xf]  ;;  %v1986_v3 = vld [vmem:[%s2995_s2 + $0x4] sm:$0xf]  ;;  %v2022_v4 = vld [vmem:[%s2995_s2 + $0x1c] sm:$0xf] }
   0xd   : > { %1969 = vmatpush.msk.msra.mxu2 %vm363_vm0, %v1968_v2  ;;  %2157 = vmatpush.msk.msra.mxu3 %vm363_vm0, %v1968_v2  ;;  %s2159_s17 = smul.u32 240, %s3003_s28  ;;  %vm338_vm1 = vcmask 31744   ;;  %v2040_v18 = vld [vmem:[%s2995_s2 + $0x8] sm:$0xf]  ;;  %v1079_v19 = vld [vmem:[%s2997_s4] sm:$0xf] }
   0xe   : > { %2023 = vmatpush.msk.msrb.mxu1 %vm363_vm0, %v2022_v4  ;;  %1959 = vmatpush.msk.msrb.mxu0 %vm363_vm0, %v334_v1  ;;  %v2004_v20 = vld [vmem:[%s2995_s2 + $0x10] sm:$0xf]  ;;  %v2058_v21 = vld [vmem:[%s2995_s2 + $0x14] sm:$0xf]  ;;  %s2154_s9 = sshll.u32 %s3003_s28, 6  ;;  %vm1249_vm2 = vcmask 523264  }
   0xf   : > { %1987 = vmatpush.msk.msrb.mxu3 %vm363_vm0, %v1986_v3  ;;  %s2378_s20 = scalar_lea.vmem %s2993_s0, %s2159_s17  ;;  %2041 = vmatpush.msk.msrb.mxu2 %vm363_vm0, %v2040_v18  ;;  %s2505_s12 = scalar_lea.vmem %s2994_s1, %s2154_s9  ;;  %v2076_v38 = vld [vmem:[%s2995_s2 + $0x20] sm:$0xf]  ;;  %vm1741_vm3 = vcmask 15360   ;;  %vm1863_vm4 = vcmask 64512  }
  0x10   : > { %v2381_v5 = vld [vmem:[%s2378_s20 + $0x8] sm:$0xff]  ;;  %v328_v6 = vld [vmem:[%s2378_s20 + $0x10] sm:$0xff]  ;;  %v461_v7 = vld [vmem:[%s2378_s20 + $0x40] sm:$0xff]  ;;  %s2290_s17 = smov 116   ;;  %s2955_s13 = scalar_lea.vmem %s3001_s8, %s2154_s9 }
  0x11   : > { %1951 = vmatmul.msk.f32.vlgmr.msra.gmra.mxu0 %vm338_vm1, %v2381_v5  ;;  %1962 = vmatmul.msk.f32.vlgmr.msra.gmra.mxu1 %vm338_vm1, %v328_v6  ;;  %v329_v8 = vld [vmem:[%s2378_s20 + $0x18] sm:$0xff]  ;;  %v462_v9 = vld [vmem:[%s2378_s20 + $0x48] sm:$0xff]  ;;  %v330_v10 = vld [vmem:[%s2378_s20 + $0x20] sm:$0xff] }
  0x12   : > { %1970 = vmatmul.msk.f32.vlgmr.msra.gmra.mxu2 %vm338_vm1, %v328_v6  ;;  %1976 = vmatmul.msk.f32.vlgmr.msra.gmra.mxu3 %vm338_vm1, %v461_v7  ;;  %v1978_v11 = vld [vmem:[%s2378_s20 + $0x50] sm:$0xff]  ;;  %v331_v12 = vld [vmem:[%s2378_s20 + $0x28] sm:$0xff]  ;;  %v1979_v13 = vld [vmem:[%s2378_s20 + $0x58] sm:$0xff] }
  0x13   : > { %v332_v14 = vld [vmem:[%s2378_s20 + $0x30] sm:$0xff]  ;;  %v1980_v15 = vld [vmem:[%s2378_s20 + $0x60] sm:$0xff]  ;;  %v333_v16 = vld [vmem:[%s2378_s20 + $0x38] sm:$0xff]  ;;  %2086 = vmatpush.msk.msra.mxu1 %vm363_vm0, %v1079_v19  ;;  %2005 = vmatpush.msk.msra.mxu0 %vm363_vm0, %v2004_v20 }
  0x14   : > { %v1981_v17 = vld [vmem:[%s2378_s20 + $0x68] sm:$0xff]  ;;  %2059 = vmatpush.msk.msra.mxu3 %vm363_vm0, %v2058_v21  ;;  %v1982_v22 = vld [vmem:[%s2378_s20 + $0x70] sm:$0xff]  ;;  %v2032_v23 = vld [vmem:[%s2378_s20 + $0xa0] sm:$0xff] }
  0x15   : > { %v1983_v24 = vld [vmem:[%s2378_s20 + $0x78] sm:$0xff]  ;;  %v2050_v25 = vld [vmem:[%s2378_s20 + $0xa8] sm:$0xff]  ;;  %v326_v26 = vld [vmem:[%s2378_s20] sm:$0xff] }
  0x16   : > { %v1984_v27 = vld [vmem:[%s2378_s20 + $0x80] sm:$0xff]  ;;  %v2453_v28 = vld [vmem:[%s2378_s20 + $0xb0] sm:$0xff]  ;;  %v1985_v29 = vld [vmem:[%s2378_s20 + $0x88] sm:$0xff] }
  0x17   : > { %v2463_v30 = vld [vmem:[%s2378_s20 + $0xb8] sm:$0xff]  ;;  %v2471_v31 = vld [vmem:[%s2378_s20 + $0xc0] sm:$0xff]  ;;  %v2479_v32 = vld [vmem:[%s2378_s20 + $0xc8] sm:$0xff] }
  0x18   : > { %v2020_v33 = vld [vmem:[%s2378_s20 + $0x90] sm:$0xff]  ;;  %v2021_v35 = vld [vmem:[%s2378_s20 + $0x98] sm:$0xff]  ;;  %v1071_v37 = vld [vmem:[%s2505_s12] sm:$0xff] }
  0x19   : > { %1952 = vmatmul.msk.f32.gmra.mxu0 %vm338_vm1, %v328_v6  ;;  %1963 = vmatmul.msk.f32.gmra.mxu1 %vm338_vm1, %v329_v8  ;;  %v2055_v34 = vld [vmem:[%s2378_s20 + $0xd0] sm:$0xff]  ;;  %v2056_v36 = vld [vmem:[%s2378_s20 + $0xd8] sm:$0xff]  ;;  %v1072_v39 = vld [vmem:[%s2505_s12 + $0x8] sm:$0xff] }
  0x1a   : > { %1971 = vmatmul.msk.f32.gmra.mxu2 %vm338_vm1, %v329_v8  ;;  %1977 = vmatmul.msk.f32.gmra.mxu3 %vm338_vm1, %v462_v9  ;;  %v1073_v42 = vld [vmem:[%s2505_s12 + $0x10] sm:$0xff]  ;;  %v1074_v46 = vld [vmem:[%s2505_s12 + $0x18] sm:$0xff]  ;;  %v2057_v48 = vld [vmem:[%s2378_s20 + $0xe0] sm:$0xff] }
  0x1b   : > { %v1075_v52 = vld [vmem:[%s2505_s12 + $0x20] sm:$0xff]  ;;  %v1076_v57 = vld [vmem:[%s2505_s12 + $0x28] sm:$0xff]  ;;  %v1077_v62 = vld [vmem:[%s2505_s12 + $0x30] sm:$0xff] }
  0x1c   : > { %v1078_v3 = vld [vmem:[%s2505_s12 + $0x38] sm:$0xff]  ;;  %v2075_v4 = vld [vmem:[%s2378_s20 + $0xe8] sm:$0xff]  ;;  %s2291_s20 = smov 120  }
  0x21   : > { %1953 = vmatmul.msk.f32.gmra.mxu0 %vm338_vm1, %v329_v8  ;;  %1964 = vmatmul.msk.f32.gmra.mxu1 %vm338_vm1, %v330_v10 }
  0x22   : > { %1972 = vmatmul.msk.f32.gmra.mxu2 %vm338_vm1, %v330_v10  ;;  %1988 = vmatmul.msk.f32.vlgmr.msrb.gmra.mxu3 %vm338_vm1, %v1978_v11 }
  0x23   : > { %2158 = vmatpush.msk.msrb.mxu3 %vm363_vm0, %v2076_v38 }
  0x29   : > { %1954 = vmatmul.msk.f32.gmra.mxu0 %vm338_vm1, %v330_v10  ;;  %1965 = vmatmul.msk.f32.gmra.mxu1 %vm338_vm1, %v331_v12 }
  0x2a   : > { %1973 = vmatmul.msk.f32.gmra.mxu2 %vm338_vm1, %v331_v12  ;;  %1989 = vmatmul.msk.f32.gmra.mxu3 %vm338_vm1, %v1979_v13 }
  0x31   : > { %1955 = vmatmul.msk.f32.gmra.mxu0 %vm338_vm1, %v331_v12  ;;  %1966 = vmatmul.msk.f32.gmra.mxu1 %vm338_vm1, %v332_v14 }
  0x32   : > { %1974 = vmatmul.msk.f32.gmra.mxu2 %vm338_vm1, %v332_v14  ;;  %1990 = vmatmul.msk.f32.gmra.mxu3 %vm338_vm1, %v1980_v15 }
  0x39   : > { %1956 = vmatmul.msk.f32.gmra.mxu0 %vm338_vm1, %v332_v14  ;;  %1967 = vmatmul.msk.f32.gmra.mxu1 %vm338_vm1, %v333_v16 }
  0x3a   : > { %1975 = vmatmul.msk.f32.gmra.mxu2 %vm338_vm1, %v333_v16  ;;  %1991 = vmatmul.msk.f32.gmra.mxu3 %vm338_vm1, %v1981_v17 }
  0x41   : > { %1957 = vmatmul.msk.f32.gmra.mxu0 %vm338_vm1, %v333_v16  ;;  %2024 = vmatmul.msk.f32.vlgmr.msrb.gmra.mxu1 %vm338_vm1, %v1980_v15 }
  0x42   : > { %1992 = vmatmul.msk.f32.gmra.mxu3 %vm338_vm1, %v1982_v22  ;;  %2042 = vmatmul.msk.f32.vlgmr.msrb.gmra.mxu2 %vm338_vm1, %v2032_v23 }
  0x49   : > { %1958 = vmatmul.msk.f32.gmra.mxu0 %vm338_vm1, %v461_v7  ;;  %2025 = vmatmul.msk.f32.gmra.mxu1 %vm338_vm1, %v1981_v17 }
  0x4a   : > { %1993 = vmatmul.msk.f32.gmra.mxu3 %vm338_vm1, %v1983_v24  ;;  %2043 = vmatmul.msk.f32.gmra.mxu2 %vm338_vm1, %v2050_v25 }
  0x51   : > { %1960 = vmatmul.msk.f32.vlgmr.msrb.gmra.mxu0 %vm338_vm1, %v326_v26  ;;  %2026 = vmatmul.msk.f32.gmra.mxu1 %vm338_vm1, %v1982_v22 }
  0x52   : > { %1994 = vmatmul.msk.f32.gmra.mxu3 %vm338_vm1, %v1984_v27  ;;  %2044 = vmatmul.msk.f32.gmra.mxu2 %vm338_vm1, %v2453_v28 }
  0x53   : > { %2077 = vmatpush.msk.msrb.mxu0 %vm363_vm0, %v2076_v38 }
  0x59   : > { %1961 = vmatmul.msk.f32.gmra.mxu0 %vm338_vm1, %v2381_v5  ;;  %2027 = vmatmul.msk.f32.gmra.mxu1 %vm338_vm1, %v1983_v24 }
  0x5a   : > { %1995 = vmatmul.msk.f32.gmra.mxu3 %vm338_vm1, %v1985_v29  ;;  %2045 = vmatmul.msk.f32.gmra.mxu2 %vm338_vm1, %v2463_v30 }
  0x61   : > { %2006 = vmatmul.msk.f32.vlgmr.msra.gmra.mxu0 %vm338_vm1, %v1979_v13  ;;  %2028 = vmatmul.msk.f32.gmra.mxu1 %vm338_vm1, %v1984_v27 }
  0x62   : > { %2060 = vmatmul.msk.f32.vlgmr.msra.gmra.mxu3 %vm338_vm1, %v2050_v25  ;;  %2046 = vmatmul.msk.f32.gmra.mxu2 %vm338_vm1, %v2471_v31 }
  0x69   : > { %2007 = vmatmul.msk.f32.gmra.mxu0 %vm338_vm1, %v1980_v15  ;;  %2029 = vmatmul.msk.f32.gmra.mxu1 %vm338_vm1, %v1985_v29 }
  0x6a   : > { %2061 = vmatmul.msk.f32.gmra.mxu3 %vm338_vm1, %v2453_v28  ;;  %2047 = vmatmul.msk.f32.gmra.mxu2 %vm338_vm1, %v2479_v32 }
  0x71   : > { %2008 = vmatmul.msk.f32.gmra.mxu0 %vm338_vm1, %v1981_v17  ;;  %2030 = vmatmul.msk.f32.gmra.mxu1 %vm338_vm1, %v2020_v33 }
  0x72   : > { %2062 = vmatmul.msk.f32.gmra.mxu3 %vm338_vm1, %v2463_v30  ;;  %2048 = vmatmul.msk.f32.gmra.mxu2 %vm338_vm1, %v2055_v34 }
  0x79   : > { %2009 = vmatmul.msk.f32.gmra.mxu0 %vm338_vm1, %v1982_v22  ;;  %2031 = vmatmul.msk.f32.gmra.mxu1 %vm338_vm1, %v2021_v35 }
  0x7a   : > { %2063 = vmatmul.msk.f32.gmra.mxu3 %vm338_vm1, %v2471_v31  ;;  %2049 = vmatmul.msk.f32.gmra.mxu2 %vm338_vm1, %v2056_v36 }
  0x81   : > { %2010 = vmatmul.msk.f32.gmra.mxu0 %vm338_vm1, %v1983_v24  ;;  %2087 = vmatmul.msk.f32.vlgmr.msra.gmra.mxu1 %vm338_vm1, %v1071_v37 }
  0x82   : > { %2064 = vmatmul.msk.f32.gmra.mxu3 %vm338_vm1, %v2479_v32 }
  0x89   : > { %2011 = vmatmul.msk.f32.gmra.mxu0 %vm338_vm1, %v1984_v27  ;;  %2088 = vmatmul.msk.f32.gmra.mxu1 %vm338_vm1, %v1072_v39 }
  0x8a   : > { %2065 = vmatmul.msk.f32.gmra.mxu3 %vm338_vm1, %v2055_v34 }
  0x8e   : > { %v384_v40 = vpop.f32.mrf.mxu0  ;;  %v2521_v41 = vpop.f32.mrf.mxu1 }
  0x91   : > { %2012 = vmatmul.msk.f32.gmra.mxu0 %vm338_vm1, %v1985_v29  ;;  %2089 = vmatmul.msk.f32.gmra.mxu1 %vm338_vm1, %v1073_v42 }
  0x92   : > { %2066 = vmatmul.msk.f32.gmra.mxu3 %vm338_vm1, %v2056_v36 }
  0x95   : > { %v527_v43 = vpop.f32.mrf.mxu3  ;;  %v509_v47 = vpop.f32.mrf.mxu2 }
  0x96   : > { %v387_v44 = vpop.f32.mrf.mxu0  ;;  %v2527_v45 = vpop.f32.mrf.mxu1 }
  0x99   : > { %2013 = vmatmul.msk.f32.gmra.mxu0 %vm338_vm1, %v2020_v33  ;;  %2090 = vmatmul.msk.f32.gmra.mxu1 %vm338_vm1, %v1074_v46 }
  0x9a   : > { %2067 = vmatmul.msk.f32.gmra.mxu3 %vm338_vm1, %v2057_v48 }
  0x9d   : > { %v530_v49 = vpop.f32.mrf.mxu3  ;;  %v512_v53 = vpop.f32.mrf.mxu2 }
  0x9e   : > { %v2534_v50 = vpop.f32.mrf.mxu0  ;;  %v2536_v51 = vpop.f32.mrf.mxu1 }
  0xa1   : > { %2078 = vmatmul.msk.f32.vlgmr.msrb.gmra.mxu0 %vm338_vm1, %v2453_v28  ;;  %2091 = vmatmul.msk.f32.gmra.mxu1 %vm338_vm1, %v1075_v52 }
  0xa2   : > { %2082 = vmatmul.msk.f32.vlgmr.msrb.gmra.mxu3 %vm338_vm1, %v2055_v34 }
  0xa5   : > { %v596_v54 = vpop.f32.mrf.mxu3  ;;  %v515_v58 = vpop.f32.mrf.mxu2 }
  0xa6   : > { %v2543_v55 = vpop.f32.mrf.mxu0  ;;  %v2545_v56 = vpop.f32.mrf.mxu1 }
  0xa9   : > { %2079 = vmatmul.msk.f32.gmra.mxu0 %vm338_vm1, %v2463_v30  ;;  %2092 = vmatmul.msk.f32.gmra.mxu1 %vm338_vm1, %v1076_v57 }
  0xaa   : > { %2083 = vmatmul.msk.f32.gmra.mxu3 %vm338_vm1, %v2056_v36 }
  0xad   : > { %v599_v59 = vpop.f32.mrf.mxu3  ;;  %v518_v63 = vpop.f32.mrf.mxu2 }
  0xae   : > { %v2552_v60 = vpop.f32.mrf.mxu0  ;;  %v449_v61 = vpop.f32.mrf.mxu1 }
  0xb1   : > { %2080 = vmatmul.msk.f32.gmra.mxu0 %vm338_vm1, %v2471_v31  ;;  %2093 = vmatmul.msk.f32.gmra.mxu1 %vm338_vm1, %v1077_v62 }
  0xb2   : > { %2084 = vmatmul.msk.f32.gmra.mxu3 %vm338_vm1, %v2057_v48 }
  0xb5   : > { %v602_v0 = vpop.f32.mrf.mxu3  ;;  %v521_v8 = vpop.f32.mrf.mxu2 }
  0xb6   : > { %v2559_v1 = vpop.f32.mrf.mxu0  ;;  %v452_v2 = vpop.f32.mrf.mxu1 }
  0xb9   : > { %2081 = vmatmul.msk.f32.gmra.mxu0 %vm338_vm1, %v2479_v32  ;;  %2094 = vmatmul.msk.f32.gmra.mxu1 %vm338_vm1, %v1078_v3  ;;  %v441_v3 = vadd.f32 %v2527_v45, %v2543_v55 }
  0xba   : > { %2085 = vmatmul.msk.f32.gmra.mxu3 %vm338_vm1, %v2075_v4 }
  0xbd   : > { %v605_v5 = vpop.f32.mrf.mxu3  ;;  %v2567_v12 = vpop.f32.mrf.mxu2 }
  0xbe   : > { %v402_v6 = vpop.f32.mrf.mxu0  ;;  %v768_v7 = vpop.f32.mrf.mxu1 }
  0xbf   : > { %v450_v16 = vadd.f32 %v449_v61, %v402_v6  ;;  %v536_v6 = vadd.f32 %v518_v63, %v441_v3 }
  0xc1   : > { %v539_v19 = vadd.f32 %v527_v43, %v450_v16 }
  0xc5   : > { %v608_v9 = vpop.f32.mrf.mxu3  ;;  %v855_v17 = vpop.f32.mrf.mxu2 }
  0xc6   : > { %v405_v10 = vpop.f32.mrf.mxu0  ;;  %v771_v11 = vpop.f32.mrf.mxu1 }
  0xc7   : > { %v453_v25 = vadd.f32 %v452_v2, %v405_v10  ;;  %v623_v10 = vadd.f32 %v605_v5, %v536_v6 }
  0xc9   : > { %v540_v29 = vadd.f32 %v530_v49, %v453_v25 }
  0xcd   : > { %v2569_v13 = vpop.f32.mrf.mxu3  ;;  %v858_v28 = vpop.f32.mrf.mxu2 }
  0xce   : > { %v431_v14 = vpop.f32.mrf.mxu0  ;;  %v774_v15 = vpop.f32.mrf.mxu1 }
  0xcf   : > { %v432_v18 = vadd.f32 %v431_v14, %v384_v40 }
  0xd1   : > { %v533_v24 = vadd.f32 %v509_v47, %v432_v18  ;;  %v438_v47 = vadd.f32 %v2521_v41, %v2534_v50 }
  0xd3   : > { %v620_v27 = vadd.f32 %v596_v54, %v533_v24  ;;  %v535_v49 = vadd.f32 %v515_v58, %v438_v47 }
  0xd5   : > { %v614_v20 = vpop.f32.mrf.mxu3  ;;  %v861_v40 = vpop.f32.mrf.mxu2  ;;  %v622_v54 = vadd.f32 %v602_v0, %v535_v49 }
  0xd6   : > { %v2571_v21 = vadd.f32 %v614_v20, %v539_v19  ;;  %v434_v22 = vpop.f32.mrf.mxu0  ;;  %v777_v23 = vpop.f32.mrf.mxu1 }
  0xd7   : > { %v435_v26 = vadd.f32 %v434_v22, %v387_v44 }
  0xd9   : > { %v534_v34 = vadd.f32 %v512_v53, %v435_v26 }
  0xdb   : > { %v621_v38 = vadd.f32 %v599_v59, %v534_v34 }
  0xdd   : > { %v617_v30 = vpop.f32.mrf.mxu3  ;;  %v864_v2 = vpop.f32.mrf.mxu2 }
  0xde   : > { %v2573_v31 = vadd.f32 %v617_v30, %v540_v29  ;;  %v682_v32 = vpop.f32.mrf.mxu0  ;;  %v780_v33 = vpop.f32.mrf.mxu1 }
  0xdf   : > { %v706_v35 = vadd.f32 %v682_v32, %v620_v27 }
  0xe1   : > { %v792_v36 = vadd.f32 %v768_v7, %v706_v35 }
  0xe3   : > { %v879_v37 = vadd.f32 %v855_v17, %v792_v36 }
  0xe5   : > { %v941_v39 = vpop.f32.mrf.mxu3  ;;  %v867_v17 = vpop.f32.mrf.mxu2 }
  0xe6   : > { %v2575_v42 = vadd.f32 %v941_v39, %v879_v37  ;;  %v685_v43 = vpop.f32.mrf.mxu0  ;;  %v783_v46 = vpop.f32.mrf.mxu1 }
  0xe7   : > { %v707_v44 = vadd.f32 %v685_v43, %v621_v38 }
  0xe9   : > { %v793_v48 = vadd.f32 %v771_v11, %v707_v44  ;;  %v444_v11 = vadd.f32 %v2536_v51, %v2552_v60 }
  0xeb   : > { %v880_v52 = vadd.f32 %v858_v28, %v793_v48  ;;  %v537_v18 = vadd.f32 %v521_v8, %v444_v11 }
  0xed   : > { %v944_v57 = vpop.f32.mrf.mxu3  ;;  %v624_v20 = vadd.f32 %v608_v9, %v537_v18  ;;  %v870_v27 = vpop.f32.mrf.mxu2 }
  0xee   : > { %v2579_v53 = vadd.f32 %v944_v57, %v880_v52  ;;  %v688_v61 = vpop.f32.mrf.mxu0  ;;  %v786_v62 = vpop.f32.mrf.mxu1 }
  0xef   : > { %v708_v59 = vadd.f32 %v688_v61, %v622_v54 }
  0xf1   : > { %v794_v4 = vadd.f32 %v774_v15, %v708_v59  ;;  %v447_v15 = vadd.f32 %v2545_v56, %v2559_v1 }
  0xf3   : > { %v881_v7 = vadd.f32 %v861_v40, %v794_v4  ;;  %v538_v25 = vadd.f32 %v2567_v12, %v447_v15 }
  0xf5   : > { %v947_v14 = vpop.f32.mrf.mxu3  ;;  %v625_v51 = vadd.f32 %v2569_v13, %v538_v25  ;;  %v873_v34 = vpop.f32.mrf.mxu2  ;;  %v2215_v13 = vld [vmem:[%s2998_s5] ss:$0 sm:$0xff] }
  0xf6   : > { %v2583_v41 = vadd.f32 %v947_v14, %v881_v7  ;;  %v691_v50 = vpop.f32.mrf.mxu0  ;;  %v789_v58 = vpop.f32.mrf.mxu1 }
  0xf7   : > { %v709_v0 = vadd.f32 %v691_v50, %v623_v10 }
  0xf9   : > { %v795_v16 = vadd.f32 %v777_v23, %v709_v0 }
  0xfb   : > { %v882_v19 = vadd.f32 %v864_v2, %v795_v16 }
  0xfd   : > { %v950_v22 = vpop.f32.mrf.mxu3  ;;  %v876_v44 = vpop.f32.mrf.mxu2 }
  0xfe   : > { %v2587_v45 = vadd.f32 %v950_v22, %v882_v19  ;;  %v694_v55 = vpop.f32.mrf.mxu0  ;;  %v1128_v63 = vpop.f32.mrf.mxu1 }
  0xff   : > { %v710_v5 = vadd.f32 %v694_v55, %v624_v20  ;;  %v2616_v4 = vadd.f32 %v2215_v13, %v1128_v63 }
 0x101   : > { %v796_v24 = vadd.f32 %v780_v33, %v710_v5 }
 0x103   : > { %v883_v26 = vadd.f32 %v867_v17, %v796_v24 }
 0x105   : > { %v953_v60 = vpop.f32.mrf.mxu3 }
 0x106   : > { %v969_v8 = vadd.f32 %v953_v60, %v883_v26  ;;  %v697_v23 = vpop.f32.mrf.mxu0  ;;  %v2593_v9 = vpop.f32.mrf.mxu1 }
 0x107   : > { %v711_v28 = vadd.f32 %v697_v23, %v625_v51  ;;  %v2660_v15 = vadd.f32 %v2215_v13, %v2593_v9 }
 0x109   : > { %v797_v29 = vadd.f32 %v783_v46, %v711_v28 }
 0x10b   : > { %v884_v30 = vadd.f32 %v870_v27, %v797_v29 }
 0x10d   : > { %v956_v32 = vpop.f32.mrf.mxu3 }
 0x10e   : > { %v970_v35 = vadd.f32 %v956_v32, %v884_v30  ;;  %v700_v36 = vpop.f32.mrf.mxu0  ;;  %v1134_v56 = vpop.f32.mrf.mxu1 }
 0x10f   : > { %v712_v1 = vadd.f32 %v700_v36, %v2571_v21  ;;  %v2604_v57 = vadd.f32 %v2215_v13, %v1134_v56 }
 0x111   : > { %v798_v12 = vadd.f32 %v786_v62, %v712_v1  ;;  %v2614_v62 = vld [vmem:[%s2996_s3] ss:$0 sm:$0xff] }
 0x113   : > { %v885_v33 = vadd.f32 %v873_v34, %v798_v12 }
 0x115   : > { %v959_v37 = vpop.f32.mrf.mxu3 }
 0x116   : > { %v971_v38 = vadd.f32 %v959_v37, %v885_v33  ;;  %v703_v39 = vpop.f32.mrf.mxu0  ;;  %v1137_v40 = vpop.f32.mrf.mxu1 }
 0x117   : > { %v713_v43 = vadd.f32 %v703_v39, %v2573_v31  ;;  %v2600_v46 = vadd.f32 %v2215_v13, %v1137_v40 }
 0x119   : > { %1449 = vrot.lane.b32.xlu2 %v2600_v46, %s2290_s17  ;;  %v799_v21 = vadd.f32 %v789_v58, %v713_v43  ;;  %v2697_v51 = vpack.i.bf16 %v2604_v57, %v2600_v46 }
 0x11b   : > { %v886_v47 = vadd.f32 %v876_v44, %v799_v21 }
 0x11d   : > { %v962_v48 = vpop.f32.mrf.mxu3 }
 0x11e   : > { %v972_v49 = vadd.f32 %v962_v48, %v886_v47  ;;  %v1027_v52 = vpop.f32.mrf.mxu0  ;;  %v1140_v54 = vpop.f32.mrf.mxu1 }
 0x11f   : > { %v2607_v61 = vadd.f32 %v1027_v52, %v2575_v42  ;;  %v2630_v0 = vadd.f32 %v2215_v13, %v1140_v54 }
 0x121   : > { %1447 = vrot.lane.b32.xlu2 %v2604_v57, %s2290_s17 }
 0x125   : > { %v1039_v31 = vpop.f32.mrf.mxu3 }
 0x126   : > { %v1055_v59 = vadd.f32 %v1039_v31, %v969_v8  ;;  %v1030_v2 = vpop.f32.mrf.mxu0  ;;  %v1143_v3 = vpop.f32.mrf.mxu1  ;;  %v2702_v8 = vpack.i.bf16 %v2616_v4, %v2660_v15 }
 0x127   : > { %v2619_v6 = vadd.f32 %v1030_v2, %v2579_v53  ;;  %v2621_v7 = vadd.f32 %v2215_v13, %v1143_v3 }
 0x128   : > { %v2624_v42 = vadd.f32 %v2614_v62, %v1055_v59 }
 0x129   : > { %1453 = vrot.lane.b32.xlu1 %v2621_v7, %s2290_s17  ;;  %1443 = vrot.lane.b32.xlu2 %v2616_v4, %s2290_s17  ;;  %v2680_v25 = vpack.i.bf16 %v2630_v0, %v2621_v7 }
 0x12d   : > { %v1042_v10 = vpop.f32.mrf.mxu3 }
 0x12e   : > { %v1056_v14 = vadd.f32 %v1042_v10, %v970_v35  ;;  %v1033_v50 = vpop.f32.mrf.mxu0  ;;  %v1146_v58 = vpop.f32.mrf.mxu1 }
 0x12f   : > { %v2633_v53 = vadd.f32 %v1033_v50, %v2583_v41 }
 0x130   : > { %v2636_v11 = vadd.f32 %v2614_v62, %v1056_v14 }
 0x131   : > { %1451 = vrot.lane.b32.xlu1 %v2630_v0, %s2290_s17  ;;  %1170 = vrot.lane.b32.xlu2 %v2621_v7, %s2291_s20 }
 0x135   : > { %v1045_v16 = vpop.f32.mrf.mxu3 }
 0x136   : > { %v1057_v17 = vadd.f32 %v1045_v16, %v971_v38  ;;  %v1036_v18 = vpop.f32.mrf.mxu0  ;;  %v1149_v19 = vpop.f32.mrf.mxu1 }
 0x137   : > { %v1054_v20 = vadd.f32 %v1036_v18, %v2587_v45  ;;  %v2643_v22 = vadd.f32 %v2215_v13, %v1149_v19  ;;  %v2657_v45 = vadd.f32 %v2215_v13, %v1146_v58 }
 0x138   : > { %v2646_v41 = vadd.f32 %v2614_v62, %v1057_v17 }
 0x139   : > { %v2649_v55 = vadd.f32 %v2614_v62, %v1054_v20  ;;  %1457 = vrot.lane.b32.xlu0 %v2643_v22, %s2290_s17  ;;  %1174 = vrot.lane.b32.xlu1 %v2643_v22, %s2291_s20  ;;  %v2195_v26 = vpack.i.bf16 %v2657_v45, %v2643_v22 }
 0x13a   : > { %1166 = vrot.lane.b32.xlu2 %v2600_v46, %s2291_s20 }
 0x13d   : > { %v1048_v63 = vpop.f32.mrf.mxu3 }
 0x13e   : > { %v1058_v5 = vadd.f32 %v1048_v63, %v972_v49 }
 0x140   : > { %v2663_v24 = vadd.f32 %v2614_v62, %v1058_v5 }
 0x141   : > { %1455 = vrot.lane.b32.xlu0 %v2657_v45, %s2290_s17  ;;  %1427 = vrot.lane.b32.xlu1 %v2616_v4, %s2292_s21 }
 0x142   : > { %1162 = vrot.lane.b32.xlu2 %v2660_v15, %s2291_s20 }
 0x149   : > { %1445 = vrot.lane.b32.xlu0 %v2660_v15, %s2290_s17  ;;  %1429 = vrot.lane.b32.xlu1 %v2660_v15, %s2292_s21 }
 0x14a   : > { %1435 = vrot.lane.b32.xlu2 %v2630_v0, %s2292_s21 }
 0x151   : > { %1172 = vrot.lane.b32.xlu0 %v2657_v45, %s2291_s20  ;;  %1431 = vrot.lane.b32.xlu1 %v2604_v57, %s2292_s21 }
 0x152   : > { %1441 = vrot.lane.b32.xlu2 %v2643_v22, %s2292_s21 }
 0x159   : > { %1168 = vrot.lane.b32.xlu0 %v2630_v0, %s2291_s20  ;;  %1433 = vrot.lane.b32.xlu1 %v2600_v46, %s2292_s21 }
 0x15a   : > { %2176 = vrot.lane.b32.xlu2 %v2680_v25, %s2293_s22 }
 0x161   : > { %1164 = vrot.lane.b32.xlu0 %v2604_v57, %s2291_s20  ;;  %1439 = vrot.lane.b32.xlu1 %v2657_v45, %s2292_s21 }
 0x162   : > { %2196 = vrot.lane.b32.xlu2 %v2195_v26, %s2294_s23 }
 0x169   : > { %1160 = vrot.lane.b32.xlu0 %v2616_v4, %s2291_s20  ;;  %2191 = vrot.lane.b32.xlu1 %v2195_v26, %s2293_s22 }
 0x171   : > { %1437 = vrot.lane.b32.xlu0 %v2621_v7, %s2292_s21 }
 0x173   : > { %v1450_v27 = vpop.permute.xlu2 %1449 }
 0x179   : > { %2181 = vrot.lane.b32.xlu0 %v2697_v51, %s2293_s22 }
 0x17b   : > { %v1448_v60 = vpop.permute.xlu2 %1447 }
 0x181   : > { %2186 = vrot.lane.b32.xlu0 %v2702_v8, %s2293_s22 }
 0x183   : > { %v1444_v23 = vpop.permute.xlu2 %1443 }
 0x18b   : > { %v1171_v9 = vpop.permute.xlu2 %1170 }
 0x194   : > { %v1167_v28 = vpop.permute.xlu2 %1166 }
 0x19b   : > { %v1454_v29 = vpop.permute.xlu1 %1453 }
 0x19c   : > { %v1163_v30 = vpop.permute.xlu2 %1162 }
 0x1a3   : > { %v1452_v32 = vpop.permute.xlu1 %1451 }
 0x1a4   : > { %v1436_v34 = vpop.permute.xlu2 %1435 }
 0x1ab   : > { %v1458_v35 = vpop.permute.xlu0 %1457  ;;  %v1175_v36 = vpop.permute.xlu1 %1174 }
 0x1ac   : > { %v2705_v56 = vpop.permute.xlu2 %1441  ;;  %2095 = vmatpush.xpose.msk.msra.mxu2 %vm338_vm1, %v1175_v36  ;;  %2119 = vmatpush.xpose.msk.msra.mxu0 %vm338_vm1, %v1458_v35 }
 0x1b3   : > { %v1456_v1 = vpop.permute.xlu0 %1455  ;;  %v1428_v12 = vpop.permute.xlu1 %1427 }
 0x1b4   : > { %v2177_v33 = vpop.permute.xlu2 %2176  ;;  %2120 = vmatpush.xpose.msk.msra.mxu0 %vm338_vm1, %v1456_v1 }
 0x1b5   : > { %v2178_v2 = vunpack.i.l.bf16 %v2177_v33  ;;  %v2179_v3 = vunpack.i.h.bf16 %v2177_v33 }
 0x1b8   : > { %2121 = vmatpush.xpose.msk.msra.mxu0 %vm338_vm1, %v1454_v29 }
 0x1bb   : > { %v1446_v13 = vpop.permute.xlu0 %1445  ;;  %v1430_v37 = vpop.permute.xlu1 %1429 }
 0x1bc   : > { %v2197_v38 = vpop.permute.xlu2 %2196  ;;  %2122 = vmatpush.xpose.msk.msra.mxu0 %vm338_vm1, %v1452_v32 }
 0x1bd   : > { %v2198_v39 = vunpack.i.l.bf16 %v2197_v38  ;;  %v2199_v40 = vunpack.i.h.bf16 %v2197_v38 }
 0x1bf   : > { %1394 = vmatpush.msra.mxu3 %v2198_v39 }
 0x1c0   : > { %2123 = vmatpush.xpose.msk.msra.mxu0 %vm338_vm1, %v1450_v27 }
 0x1c1   : > { %1395 = vmatpush.msra.mxu3 %v2199_v40 }
 0x1c3   : > { %v1173_v43 = vpop.permute.xlu0 %1172  ;;  %v1432_v44 = vpop.permute.xlu1 %1431 }
 0x1c4   : > { %2096 = vmatpush.xpose.msk.msra.mxu2 %vm338_vm1, %v1173_v43  ;;  %2124 = vmatpush.xpose.msk.msra.mxu0 %vm338_vm1, %v1448_v60 }
 0x1c8   : > { %2097 = vmatpush.xpose.msk.msra.mxu2 %vm338_vm1, %v1171_v9  ;;  %2125 = vmatpush.xpose.msk.msra.mxu0 %vm338_vm1, %v1446_v13 }
 0x1cb   : > { %v1169_v21 = vpop.permute.xlu0 %1168  ;;  %v1434_v47 = vpop.permute.xlu1 %1433 }
 0x1cc   : > { %2098 = vmatpush.xpose.msk.msra.mxu2 %vm338_vm1, %v1169_v21  ;;  %2126 = vmatpush.xpose.msk.msra.mxu0 %vm338_vm1, %v1444_v23 }
 0x1cf   : > { %2127 = vmatmul.msk.f32.vlgmr.msra.gmra.mxu0 %vm338_vm1, %v1428_v12 }
 0x1d0   : > { %2099 = vmatpush.xpose.msk.msra.mxu2 %vm338_vm1, %v1167_v28 }
 0x1d3   : > { %v1165_v48 = vpop.permute.xlu0 %1164  ;;  %v1440_v49 = vpop.permute.xlu1 %1439 }
 0x1d4   : > { %2100 = vmatpush.xpose.msk.msra.mxu2 %vm338_vm1, %v1165_v48 }
 0x1d7   : > { %2128 = vmatmul.msk.f32.gmra.mxu0 %vm338_vm1, %v1430_v37 }
 0x1d8   : > { %2101 = vmatpush.xpose.msk.msra.mxu2 %vm338_vm1, %v1163_v30 }
 0x1db   : > { %v1161_v52 = vpop.permute.xlu0 %1160  ;;  %v2192_v54 = vpop.permute.xlu1 %2191 }
 0x1dc   : > { %v2193_v31 = vunpack.i.l.bf16 %v2192_v54  ;;  %2102 = vmatpush.xpose.msk.msra.mxu2 %vm338_vm1, %v1161_v52  ;;  %v2194_v59 = vunpack.i.h.bf16 %v2192_v54 }
 0x1de   : > { %1676 = vmatpush.msrb.mxu1 %v2193_v31 }
 0x1df   : > { %2103 = vmatmul.msk.f32.vlgmr.msra.gmra.mxu2 %vm338_vm1, %v2616_v4  ;;  %2129 = vmatmul.msk.f32.gmra.mxu0 %vm338_vm1, %v1432_v44 }
 0x1e0   : > { %1677 = vmatpush.msrb.mxu1 %v2194_v59 }
 0x1e2   : > { %1678 = vmatpush.msrb.mxu1 %v2178_v2 }
 0x1e3   : > { %v1438_v10 = vpop.permute.xlu0 %1437 }
 0x1e4   : > { %1679 = vmatpush.msrb.mxu1 %v2179_v3 }
 0x1e7   : > { %2104 = vmatmul.msk.f32.gmra.mxu2 %vm338_vm1, %v2660_v15  ;;  %2130 = vmatmul.msk.f32.gmra.mxu0 %vm338_vm1, %v1434_v47 }
 0x1eb   : > { %v2182_v14 = vpop.permute.xlu0 %2181 }
 0x1ec   : > { %v2183_v50 = vunpack.i.l.bf16 %v2182_v14  ;;  %v2184_v58 = vunpack.i.h.bf16 %v2182_v14 }
 0x1ee   : > { %1680 = vmatpush.msrb.mxu1 %v2183_v50 }
 0x1ef   : > { %2105 = vmatmul.msk.f32.gmra.mxu2 %vm338_vm1, %v2604_v57  ;;  %2131 = vmatmul.msk.f32.gmra.mxu0 %vm338_vm1, %v1436_v34 }
 0x1f0   : > { %1681 = vmatpush.msrb.mxu1 %v2184_v58 }
 0x1f3   : > { %v2187_v4 = vpop.permute.xlu0 %2186 }
 0x1f4   : > { %v2188_v16 = vunpack.i.l.bf16 %v2187_v4  ;;  %v2189_v17 = vunpack.i.h.bf16 %v2187_v4 }
 0x1f6   : > { %1682 = vmatpush.msrb.mxu1 %v2188_v16 }
 0x1f7   : > { %2106 = vmatmul.msk.f32.gmra.mxu2 %vm338_vm1, %v2600_v46  ;;  %2132 = vmatmul.msk.f32.gmra.mxu0 %vm338_vm1, %v1438_v10 }
 0x1f8   : > { %1683 = vmatpush.msrb.mxu1 %v2189_v17 }
 0x1ff   : > { %2107 = vmatmul.msk.f32.gmra.mxu2 %vm338_vm1, %v2630_v0  ;;  %2133 = vmatmul.msk.f32.gmra.mxu0 %vm338_vm1, %v1440_v49 }
 0x207   : > { %2108 = vmatmul.msk.f32.gmra.mxu2 %vm338_vm1, %v2621_v7  ;;  %2134 = vmatmul.msk.f32.gmra.mxu0 %vm338_vm1, %v2705_v56 }
 0x20f   : > { %2109 = vmatmul.msk.f32.gmra.mxu2 %vm338_vm1, %v2657_v45 }
 0x217   : > { %2110 = vmatmul.msk.f32.gmra.mxu2 %vm338_vm1, %v2643_v22 }
 0x24c   : > { %v1508_v46 = vpop.f32.mrf.mxu0 }
 0x24d   : > { %v1532_v57 = vsel %vm1249_vm2, %v1508_v46, -inf }
 0x24e   : > { %1533 = vmax.xlane.f32.xlu0 %v1532_v57 }
 0x254   : > { %v2749_v0 = vpop.f32.mrf.mxu0 }
 0x255   : > { %v1535_v15 = vsel %vm1249_vm2, %v2749_v0, -inf }
 0x25c   : > { %v1514_v18 = vpop.f32.mrf.mxu0 }
 0x25d   : > { %v1538_v19 = vsel %vm1249_vm2, %v1514_v18, -inf }
 0x25e   : > { %1539 = vmax.xlane.f32.xlu2 %v1538_v19 }
 0x262   : > { %v1225_v7 = vpop.f32.mrf.mxu2 }
 0x263   : > { %v1250_v20 = vsel %vm1249_vm2, %v1225_v7, -inf }
 0x264   : > { %1251 = vmax.xlane.f32.xlu1 %v1250_v20  ;;  %v1517_v63 = vpop.f32.mrf.mxu0 }
 0x265   : > { %v1541_v5 = vsel %vm1249_vm2, %v1517_v63, -inf }
 0x266   : > { %1542 = vmax.xlane.f32.xlu2 %v1541_v5 }
 0x26a   : > { %v2754_v22 = vpop.f32.mrf.mxu2 }
 0x26b   : > { %v1253_v45 = vsel %vm1249_vm2, %v2754_v22, -inf }
 0x26c   : > { %1254 = vmax.xlane.f32.xlu0 %v1253_v45  ;;  %1536 = vmax.xlane.f32.xlu1 %v1535_v15  ;;  %v2764_v60 = vpop.f32.mrf.mxu0 }
 0x26d   : > { %v1544_v28 = vsel %vm1249_vm2, %v2764_v60, -inf }
 0x272   : > { %v2760_v26 = vpop.f32.mrf.mxu2 }
 0x273   : > { %v1256_v27 = vsel %vm1249_vm2, %v2760_v26, -inf }
 0x274   : > { %1257 = vmax.xlane.f32.xlu0 %v1256_v27  ;;  %v2772_v29 = vpop.f32.mrf.mxu0 }
 0x275   : > { %v1547_v34 = vsel %vm1249_vm2, %v2772_v29, -inf }
 0x27a   : > { %v2766_v23 = vpop.f32.mrf.mxu2 }
 0x27b   : > { %v1259_v9 = vsel %vm1249_vm2, %v2766_v23, -inf }
 0x27c   : > { %1260 = vmax.xlane.f32.xlu2 %v1259_v9  ;;  %1545 = vmax.xlane.f32.xlu0 %v1544_v28  ;;  %v2784_v56 = vpop.f32.mrf.mxu0 }
 0x27d   : > { %v1550_v33 = vsel %vm1249_vm2, %v2784_v56, -inf }
 0x282   : > { %v2774_v30 = vpop.f32.mrf.mxu2 }
 0x283   : > { %v1262_v32 = vsel %vm1249_vm2, %v2774_v30, -inf }
 0x284   : > { %1263 = vmax.xlane.f32.xlu1 %v1262_v32  ;;  %1548 = vmax.xlane.f32.xlu2 %v1547_v34  ;;  %v2792_v13 = vpop.f32.mrf.mxu0 }
 0x285   : > { %v1553_v37 = vsel %vm1249_vm2, %v2792_v13, -inf }
 0x28a   : > { %v2780_v35 = vpop.f32.mrf.mxu2 }
 0x28b   : > { %v1265_v36 = vsel %vm1249_vm2, %v2780_v35, -inf }
 0x28c   : > { %1266 = vmax.xlane.f32.xlu2 %v1265_v36 }
 0x292   : > { %v2786_v1 = vpop.f32.mrf.mxu2 }
 0x293   : > { %v1268_v12 = vsel %vm1249_vm2, %v2786_v1, -inf }
 0x294   : > { %1269 = vmax.xlane.f32.xlu1 %v1268_v12  ;;  %1551 = vmax.xlane.f32.xlu2 %v1550_v33 }
 0x29c   : > { %1554 = vmax.xlane.f32.xlu1 %v1553_v37 }
 0x2ac   : > { %2206 = vrot.lane.b32.xlu2 %v2697_v51, %s2294_s23 }
 0x2c1   : > { %v1534_v38 = vpop.xlane.xlu0 %1533 }
 0x2c2   : > { %v1556_v39 = vsub.f32 %v1508_v46, %v1534_v38 }
 0x2c4   : > { %v1564_v40 = vmul.f32 1.442695, %v1556_v39 }
 0x2c6   : > { %2218 = vpow2.f32 %v1564_v40 }
 0x2cc   : > { %v2798_v43 = vpop.eup %2218 }
 0x2cd   : > { %v1580_v44 = vsel %vm1249_vm2, %v2798_v43, 0.0 }
 0x2ce   : > { %1581 = vadd.xlane.f32.xlu0 %v1580_v44 }
 0x2d1   : > { %v1540_v21 = vpop.xlane.xlu2 %1539 }
 0x2d2   : > { %v1558_v49 = vsub.f32 %v1514_v18, %v1540_v21 }
 0x2d4   : > { %v1568_v54 = vmul.f32 1.442695, %v1558_v49 }
 0x2d7   : > { %v1252_v47 = vpop.xlane.xlu1 %1251 }
 0x2d8   : > { %v1274_v48 = vsub.f32 %v1225_v7, %v1252_v47 }
 0x2d9   : > { %v1543_v31 = vpop.xlane.xlu2 %1542 }
 0x2da   : > { %v1282_v52 = vmul.f32 1.442695, %v1274_v48  ;;  %v1559_v10 = vsub.f32 %v1517_v63, %v1543_v31 }
 0x2dc   : > { %2220 = vpow2.f32 %v1282_v52  ;;  %v1570_v58 = vmul.f32 1.442695, %v1559_v10  ;;  %v2851_v52 = vpop.f32.mrf.mxu2 }
 0x2dd   : > { %2222 = vpow2.f32 %v1568_v54 }
 0x2df   : > { %v2802_v59 = vpop.xlane.xlu0 %1254  ;;  %v1537_v51 = vpop.xlane.xlu1 %1536 }
 0x2e0   : > { %v1557_v2 = vsub.f32 %v2749_v0, %v1537_v51  ;;  %v1275_v51 = vsub.f32 %v2754_v22, %v2802_v59 }
 0x2e2   : > { %v2805_v3 = vpop.eup %2220  ;;  %v1566_v14 = vmul.f32 1.442695, %v1557_v2 }
 0x2e3   : > { %v1298_v50 = vsel %vm1249_vm2, %v2805_v3, 0.0  ;;  %v2809_v16 = vpop.eup %2222 }
 0x2e4   : > { %1299 = vadd.xlane.f32.xlu1 %v1298_v50  ;;  %2224 = vpow2.f32 %v1566_v14  ;;  %v1586_v46 = vsel %vm1249_vm2, %v2809_v16, 0.0 }
 0x2e5   : > { %2226 = vpow2.f32 %v1570_v58 }
 0x2e7   : > { %v1258_v4 = vpop.xlane.xlu0 %1257 }
 0x2e8   : > { %v1276_v9 = vsub.f32 %v2760_v26, %v1258_v4 }
 0x2ea   : > { %v2811_v17 = vpop.eup %2224 }
 0x2eb   : > { %v1583_v57 = vsel %vm1249_vm2, %v2811_v17, 0.0  ;;  %v2817_v19 = vpop.eup %2226 }
 0x2ec   : > { %1587 = vadd.xlane.f32.xlu1 %v1586_v46  ;;  %1584 = vadd.xlane.f32.xlu0 %v1583_v57  ;;  %v1589_v63 = vsel %vm1249_vm2, %v2817_v19, 0.0 }
 0x2ef   : > { %v1261_v0 = vpop.xlane.xlu2 %1260  ;;  %v1546_v18 = vpop.xlane.xlu0 %1545 }
 0x2f0   : > { %v1560_v7 = vsub.f32 %v2764_v60, %v1546_v18  ;;  %v1286_v60 = vmul.f32 1.442695, %v1276_v9  ;;  %v1277_v34 = vsub.f32 %v2766_v23, %v1261_v0 }
 0x2f2   : > { %v1572_v20 = vmul.f32 1.442695, %v1560_v7  ;;  %v1288_v36 = vmul.f32 1.442695, %v1277_v34 }
 0x2f4   : > { %1590 = vadd.xlane.f32.xlu1 %v1589_v63  ;;  %2228 = vpow2.f32 %v1572_v20 }
 0x2f7   : > { %v1549_v5 = vpop.xlane.xlu2 %1548  ;;  %v1264_v23 = vpop.xlane.xlu1 %1263 }
 0x2f8   : > { %v1561_v45 = vsub.f32 %v2772_v29, %v1549_v5  ;;  %v1278_v10 = vsub.f32 %v2774_v30, %v1264_v23 }
 0x2fa   : > { %v1574_v15 = vmul.f32 1.442695, %v1561_v45  ;;  %v2823_v27 = vpop.eup %2228  ;;  %v1290_v50 = vmul.f32 1.442695, %v1278_v10 }
 0x2fb   : > { %v1592_v28 = vsel %vm1249_vm2, %v2823_v27, 0.0 }
 0x2fc   : > { %2230 = vpow2.f32 %v1574_v15  ;;  %1593 = vadd.xlane.f32.xlu1 %v1592_v28 }
 0x2fd   : > { %2232 = vpow2.f32 %v1286_v60 }
 0x2fe   : > { %2234 = vpow2.f32 %v1288_v36 }
 0x2ff   : > { %v1267_v26 = vpop.xlane.xlu2 %1266 }
 0x300   : > { %2201 = vrot.lane.b32.xlu0 %v2680_v25, %s2294_s23  ;;  %v1279_v33 = vsub.f32 %v2780_v35, %v1267_v26 }
 0x302   : > { %v2830_v32 = vpop.eup %2230  ;;  %v1292_v25 = vmul.f32 1.442695, %v1279_v33 }
 0x303   : > { %v1595_v29 = vsel %vm1249_vm2, %v2830_v32, 0.0  ;;  %v2835_v12 = vpop.eup %2232 }
 0x304   : > { %1596 = vadd.xlane.f32.xlu2 %v1595_v29  ;;  %v1304_v37 = vsel %vm1249_vm2, %v2835_v12, 0.0  ;;  %v2840_v38 = vpop.eup %2234  ;;  %2236 = vpow2.f32 %v1292_v25 }
 0x305   : > { %v1307_v39 = vsel %vm1249_vm2, %v2840_v38, 0.0 }
 0x307   : > { %v1270_v44 = vpop.xlane.xlu1 %1269  ;;  %v1552_v21 = vpop.xlane.xlu2 %1551 }
 0x308   : > { %v1562_v47 = vsub.f32 %v2784_v56, %v1552_v21  ;;  %v1284_v56 = vmul.f32 1.442695, %v1275_v51  ;;  %v1280_v58 = vsub.f32 %v2786_v1, %v1270_v44 }
 0x30a   : > { %v2846_v40 = vpop.eup %2236  ;;  %v1576_v48 = vmul.f32 1.442695, %v1562_v47  ;;  %v1294_v30 = vmul.f32 1.442695, %v1280_v58 }
 0x30b   : > { %v1313_v35 = vsel %vm1249_vm2, %v2846_v40, 0.0 }
 0x30c   : > { %1305 = vadd.xlane.f32.xlu2 %v1304_v37  ;;  %2238 = vpow2.f32 %v1576_v48 }
 0x30f   : > { %v1555_v49 = vpop.xlane.xlu1 %1554  ;;  %v2207_v29 = vpop.permute.xlu2 %2206 }
 0x310   : > { %v1563_v54 = vsub.f32 %v2792_v13, %v1555_v49  ;;  %v2208_v25 = vunpack.i.l.bf16 %v2207_v29  ;;  %v2209_v23 = vunpack.i.h.bf16 %v2207_v29 }
 0x312   : > { %v1578_v31 = vmul.f32 1.442695, %v1563_v54  ;;  %v2858_v2 = vpop.eup %2238 }
 0x313   : > { %v1598_v14 = vsel %vm1249_vm2, %v2858_v2, 0.0 }
 0x314   : > { %1308 = vadd.xlane.f32.xlu2 %v1307_v39  ;;  %2240 = vpow2.f32 %v1578_v31 }
 0x315   : > { %2211 = vrot.lane.b32.xlu1 %v2702_v8, %s2294_s23  ;;  %v1271_v8 = vsel %vm1249_vm2, %v2851_v52, -inf  ;;  %2242 = vpow2.f32 %v1284_v56 }
 0x316   : > { %2244 = vpow2.f32 %v1290_v50 }
 0x317   : > { %2246 = vpow2.f32 %v1294_v30 }
 0x31a   : > { %v2863_v13 = vpop.eup %2240 }
 0x31b   : > { %v1601_v22 = vsel %vm1249_vm2, %v2863_v13, 0.0  ;;  %v2868_v59 = vpop.eup %2242 }
 0x31c   : > { %1314 = vadd.xlane.f32.xlu2 %v1313_v35  ;;  %v2870_v4 = vpop.eup %2244  ;;  %v1301_v46 = vsel %vm1249_vm2, %v2868_v59, 0.0 }
 0x31d   : > { %v1310_v0 = vsel %vm1249_vm2, %v2870_v4, 0.0  ;;  %v2876_v1 = vpop.eup %2246 }
 0x31e   : > { %v1316_v20 = vsel %vm1249_vm2, %v2876_v1, 0.0 }
 0x32a   : > { %1272 = vmax.xlane.f32.xlu0 %v1271_v8 }
 0x332   : > { %1599 = vadd.xlane.f32.xlu0 %v1598_v14 }
 0x33a   : > { %1602 = vadd.xlane.f32.xlu0 %v1601_v22 }
 0x33f   : > { %1302 = vadd.xlane.f32.xlu1 %v1301_v46 }
 0x341   : > { %v1582_v57 = vpop.xlane.xlu0 %1581 }
 0x342   : > { %2248 = vrcp.f32 %v1582_v57  ;;  %1311 = vadd.xlane.f32.xlu0 %v1310_v0 }
 0x348   : > { %v2249_v18 = vpop.eup %2248 }
 0x349   : > { %v1612_v7 = vmul.f32 %v2249_v18, %v2798_v43 }
 0x34a   : > { %1317 = vadd.xlane.f32.xlu0 %v1316_v20 }
 0x34b   : > { %2135 = vmatmul.msk.f32.vlgmr.msrb.gmra.mxu1 %vm1249_vm2, %v1612_v7 }
 0x357   : > { %v1300_v63 = vpop.xlane.xlu1 %1299 }
 0x35f   : > { %v1585_v5 = vpop.xlane.xlu0 %1584  ;;  %v1588_v45 = vpop.xlane.xlu1 %1587 }
 0x360   : > { %2250 = vrcp.f32 %v1585_v5 }
 0x361   : > { %2252 = vrcp.f32 %v1588_v45 }
 0x366   : > { %v2251_v15 = vpop.eup %2250 }
 0x367   : > { %v1613_v9 = vmul.f32 %v2251_v15, %v2811_v17  ;;  %v1591_v28 = vpop.xlane.xlu1 %1590  ;;  %v2253_v60 = vpop.eup %2252 }
 0x368   : > { %2254 = vrcp.f32 %v1591_v28  ;;  %v1614_v43 = vmul.f32 %v2253_v60, %v2809_v16 }
 0x369   : > { %2136 = vmatmul.msk.f32.gmra.mxu1 %vm1249_vm2, %v1613_v9 }
 0x36e   : > { %v2255_v33 = vpop.eup %2254 }
 0x36f   : > { %v1594_v36 = vpop.xlane.xlu1 %1593  ;;  %v1615_v17 = vmul.f32 %v2255_v33, %v2817_v19 }
 0x370   : > { %2256 = vrcp.f32 %v1594_v36 }
 0x371   : > { %2137 = vmatmul.msk.f32.gmra.mxu1 %vm1249_vm2, %v1614_v43 }
 0x372   : > { %v2202_v34 = vpop.permute.xlu0 %2201 }
 0x373   : > { %v2203_v26 = vunpack.i.l.bf16 %v2202_v34  ;;  %v2204_v37 = vunpack.i.h.bf16 %v2202_v34 }
 0x375   : > { %1396 = vmatpush.msra.mxu3 %v2203_v26 }
 0x376   : > { %v2257_v16 = vpop.eup %2256 }
 0x377   : > { %1397 = vmatpush.msra.mxu3 %v2204_v37  ;;  %v1597_v39 = vpop.xlane.xlu2 %1596  ;;  %v1616_v44 = vmul.f32 %v2257_v16, %v2823_v27 }
 0x378   : > { %2258 = vrcp.f32 %v1597_v39 }
 0x379   : > { %1398 = vmatpush.msra.mxu3 %v2208_v25  ;;  %2138 = vmatmul.msk.f32.gmra.mxu1 %vm1249_vm2, %v1615_v17  ;;  %2260 = vrcp.f32 %v1300_v63 }
 0x37b   : > { %1399 = vmatpush.msra.mxu3 %v2209_v23 }
 0x37e   : > { %v2259_v35 = vpop.eup %2258 }
 0x37f   : > { %v1617_v47 = vmul.f32 %v2259_v35, %v2830_v32  ;;  %v2261_v48 = vpop.eup %2260  ;;  %v1306_v58 = vpop.xlane.xlu2 %1305 }
 0x380   : > { %v1330_v54 = vmul.f32 %v2261_v48, %v2805_v3 }
 0x381   : > { %2139 = vmatmul.msk.f32.gmra.mxu1 %vm1249_vm2, %v1616_v44 }
 0x387   : > { %v2212_v21 = vpop.permute.xlu1 %2211  ;;  %v1309_v57 = vpop.xlane.xlu2 %1308 }
 0x388   : > { %v2213_v49 = vunpack.i.l.bf16 %v2212_v21  ;;  %v2214_v19 = vunpack.i.h.bf16 %v2212_v21 }
 0x389   : > { %2140 = vmatmul.msk.f32.gmra.mxu1 %vm1249_vm2, %v1617_v47 }
 0x38a   : > { %1400 = vmatpush.msra.mxu3 %v2213_v49 }
 0x38c   : > { %1401 = vmatpush.msra.mxu3 %v2214_v19 }
 0x38d   : > { %2111 = vmatmul.msk.f32.vlgmr.msra.gmra.mxu3 %vm1249_vm2, %v1330_v54 }
 0x39d   : > { %v1273_v8 = vpop.xlane.xlu0 %1272 }
 0x39e   : > { %v1281_v27 = vsub.f32 %v2851_v52, %v1273_v8 }
 0x3a0   : > { %v1296_v31 = vmul.f32 1.442695, %v1281_v27 }
 0x3a2   : > { %2262 = vpow2.f32 %v1296_v31 }
 0x3a5   : > { %v1600_v51 = vpop.xlane.xlu0 %1599 }
 0x3a6   : > { %2264 = vrcp.f32 %v1600_v51 }
 0x3a8   : > { %v2895_v10 = vpop.eup %2262 }
 0x3a9   : > { %v1319_v32 = vsel %vm1249_vm2, %v2895_v10, 0.0 }
 0x3aa   : > { %1320 = vadd.xlane.f32.xlu1 %v1319_v32 }
 0x3ac   : > { %v2265_v56 = vpop.eup %2264 }
 0x3ad   : > { %v1603_v14 = vpop.xlane.xlu0 %1602  ;;  %v1618_v3 = vmul.f32 %v2265_v56, %v2858_v2 }
 0x3ae   : > { %2266 = vrcp.f32 %v1603_v14  ;;  %v2217_v14 = vld [vmem:[%s3000_s7] ss:$0 sm:$0xff] }
 0x3af   : > { %2141 = vmatmul.msk.f32.gmra.mxu1 %vm1249_vm2, %v1618_v3 }
 0x3b2   : > { %v1303_v50 = vpop.xlane.xlu1 %1302 }
 0x3b3   : > { %2268 = vrcp.f32 %v1303_v50 }
 0x3b4   : > { %v2267_v52 = vpop.eup %2266  ;;  %2270 = vrcp.f32 %v1306_v58 }
 0x3b5   : > { %v1619_v22 = vmul.f32 %v2267_v52, %v2863_v13  ;;  %2272 = vrcp.f32 %v1309_v57  ;;  %v1312_v18 = vpop.xlane.xlu0 %1311 }
 0x3b6   : > { %2274 = vrcp.f32 %v1312_v18 }
 0x3b7   : > { %2142 = vmatmul.msk.f32.gmra.mxu1 %vm1249_vm2, %v1619_v22 }
 0x3b9   : > { %v2269_v30 = vpop.eup %2268 }
 0x3ba   : > { %v1331_v46 = vmul.f32 %v2269_v30, %v2868_v59  ;;  %v2271_v0 = vpop.eup %2270  ;;  %v1315_v59 = vpop.xlane.xlu2 %1314 }
 0x3bb   : > { %v1332_v2 = vmul.f32 %v2271_v0, %v2835_v12  ;;  %v2273_v7 = vpop.eup %2272  ;;  %2276 = vrcp.f32 %v1315_v59 }
 0x3bc   : > { %2112 = vmatmul.msk.f32.gmra.mxu3 %vm1249_vm2, %v1331_v46  ;;  %v1333_v13 = vmul.f32 %v2273_v7, %v2840_v38  ;;  %v2275_v63 = vpop.eup %2274 }
 0x3bd   : > { %v1334_v5 = vmul.f32 %v2275_v63, %v2870_v4  ;;  %v1318_v12 = vpop.xlane.xlu0 %1317  ;;  %v1063_v63 = vadd.f32 %v2614_v62, %v2607_v61 }
 0x3be   : > { %2278 = vrcp.f32 %v1318_v12 }
 0x3c1   : > { %v2277_v45 = vpop.eup %2276 }
 0x3c2   : > { %v1335_v15 = vmul.f32 %v2277_v45, %v2846_v40  ;;  %v1750_v40 = vld [vmem:[%s2999_s6] sm:$0xf] }
 0x3c3   : > { %2143 = vmatpush.msk.msrb.mxu2 %vm363_vm0, %v1750_v40 }
 0x3c4   : > { %2113 = vmatmul.msk.f32.gmra.mxu3 %vm1249_vm2, %v1332_v2  ;;  %v2279_v9 = vpop.eup %2278 }
 0x3c5   : > { %v1336_v28 = vmul.f32 %v2279_v9, %v2876_v1 }
 0x3c8   : > { %v1685_v20 = vpop.f32.mrf.mxu1 }
 0x3c9   : > { %1717 = vrot.lane.b32.xlu2 %v1685_v20, %s2295_s24 }
 0x3cc   : > { %2114 = vmatmul.msk.f32.gmra.mxu3 %vm1249_vm2, %v1333_v13 }
 0x3d4   : > { %2115 = vmatmul.msk.f32.gmra.mxu3 %vm1249_vm2, %v1334_v5 }
 0x3dc   : > { %2116 = vmatmul.msk.f32.gmra.mxu3 %vm1249_vm2, %v1335_v15 }
 0x3e4   : > { %2117 = vmatmul.msk.f32.gmra.mxu3 %vm1249_vm2, %v1336_v28  ;;  %v1065_v28 = vadd.f32 %v2614_v62, %v2633_v53 }
 0x3e6   : > { %v1688_v38 = vpop.f32.mrf.mxu1 }
 0x3e7   : > { %1719 = vrot.lane.b32.xlu0 %v1688_v38, %s2295_s24 }
 0x3ee   : > { %v1691_v60 = vpop.f32.mrf.mxu1 }
 0x3ef   : > { %1721 = vrot.lane.b32.xlu1 %v1691_v60, %s2295_s24 }
 0x3f6   : > { %v1694_v4 = vpop.f32.mrf.mxu1 }
 0x3f7   : > { %1723 = vrot.lane.b32.xlu0 %v1694_v4, %s2295_s24  ;;  %v1064_v4 = vadd.f32 %v2614_v62, %v2619_v6 }
 0x3fe   : > { %v1697_v43 = vpop.f32.mrf.mxu1 }
 0x3ff   : > { %1725 = vrot.lane.b32.xlu2 %v1697_v43, %s2295_s24 }
 0x406   : > { %v1700_v1 = vpop.f32.mrf.mxu1 }
 0x407   : > { %1727 = vrot.lane.b32.xlu1 %v1700_v1, %s2295_s24 }
 0x410   : > { %v1403_v29 = vpop.f32.mrf.mxu3 }
 0x41d   : > { %v1321_v34 = vpop.xlane.xlu1 %1320 }
 0x41e   : > { %2280 = vrcp.f32 %v1321_v34 }
 0x423   : > { %v1718_v36 = vpop.permute.xlu2 %1717 }
 0x424   : > { %v1742_v26 = vsel %vm1741_vm3, %v1403_v29, %v1718_v36  ;;  %v2281_v33 = vpop.eup %2280 }
 0x425   : > { %2144 = vmatmul.msk.f32.vlgmr.msrb.gmra.mxu2 %vm338_vm1, %v1742_v26  ;;  %v1337_v37 = vmul.f32 %v2281_v33, %v2895_v10 }
 0x427   : > { %2118 = vmatmul.msk.f32.gmra.mxu3 %vm1249_vm2, %v1337_v37 }
 0x42c   : > { %v1703_v25 = vpop.f32.mrf.mxu1 }
 0x42d   : > { %1729 = vrot.lane.b32.xlu0 %v1703_v25, %s2295_s24 }
 0x434   : > { %v1706_v17 = vpop.f32.mrf.mxu1 }
 0x435   : > { %1731 = vrot.lane.b32.xlu2 %v1706_v17, %s2295_s24 }
 0x43f   : > { %v1406_v23 = vpop.f32.mrf.mxu3 }
 0x447   : > { %v1409_v44 = vpop.f32.mrf.mxu3 }
 0x44f   : > { %v1412_v47 = vpop.f32.mrf.mxu3 }
 0x457   : > { %v1415_v19 = vpop.f32.mrf.mxu3 }
 0x459   : > { %v1720_v39 = vpop.permute.xlu0 %1719  ;;  %v1726_v54 = vpop.permute.xlu2 %1725 }
 0x45a   : > { %v1743_v16 = vsel %vm1741_vm3, %v1406_v23, %v1720_v39  ;;  %v1746_v8 = vsel %vm1741_vm3, %v1415_v19, %v1726_v54 }
 0x45b   : > { %2145 = vmatmul.msk.f32.gmra.mxu2 %vm338_vm1, %v1743_v16 }
 0x45f   : > { %v1418_v27 = vpop.f32.mrf.mxu3 }
 0x461   : > { %v1722_v35 = vpop.permute.xlu1 %1721 }
 0x462   : > { %v1744_v21 = vsel %vm1741_vm3, %v1409_v44, %v1722_v35 }
 0x463   : > { %2146 = vmatmul.msk.f32.gmra.mxu2 %vm338_vm1, %v1744_v21 }
 0x467   : > { %v1421_v10 = vpop.f32.mrf.mxu3 }
 0x469   : > { %v1724_v48 = vpop.permute.xlu0 %1723 }
 0x46a   : > { %v1745_v49 = vsel %vm1741_vm3, %v1412_v47, %v1724_v48 }
 0x46b   : > { %2147 = vmatmul.msk.f32.gmra.mxu2 %vm338_vm1, %v1745_v49 }
 0x473   : > { %2148 = vmatmul.msk.f32.gmra.mxu2 %vm338_vm1, %v1746_v8 }
 0x479   : > { %v1728_v31 = vpop.permute.xlu1 %1727 }
 0x47a   : > { %v1747_v51 = vsel %vm1741_vm3, %v1418_v27, %v1728_v31 }
 0x47b   : > { %2149 = vmatmul.msk.f32.gmra.mxu2 %vm338_vm1, %v1747_v51 }
 0x48f   : > { %v1732_v52 = vpop.permute.xlu2 %1731 }
 0x49f   : > { %v1730_v32 = vpop.permute.xlu0 %1729 }
 0x4a0   : > { %v1748_v56 = vsel %vm1741_vm3, %v1421_v10, %v1730_v32 }
 0x4a1   : > { %2150 = vmatmul.msk.f32.gmra.mxu2 %vm338_vm1, %v1748_v56 }
 0x4a8   : > { %v1799_v3 = vpop.f32.mrf.mxu2 }
 0x4a9   : > { %v1800_v50 = vadd.f32 %v2217_v14, %v1799_v3 }
 0x4aa   : > { %v1424_v58 = vpop.f32.mrf.mxu3 }
 0x4ab   : > { %1831 = vrot.lane.b32.xlu1 %v1800_v50, %s2296_s10  ;;  %v1749_v22 = vsel %vm1741_vm3, %v1424_v58, %v1732_v52 }
 0x4ac   : > { %2151 = vmatmul.msk.f32.gmra.mxu2 %vm338_vm1, %v1749_v22 }
 0x4de   : > { %v1802_v30 = vpop.f32.mrf.mxu2 }
 0x4df   : > { %v1803_v46 = vadd.f32 %v2217_v14, %v1802_v30 }
 0x4e1   : > { %1833 = vrot.lane.b32.xlu0 %v1803_v46, %s2296_s10 }
 0x4e6   : > { %v1805_v57 = vpop.f32.mrf.mxu2 }
 0x4e7   : > { %v1806_v0 = vadd.f32 %v2217_v14, %v1805_v57 }
 0x4e9   : > { %1835 = vrot.lane.b32.xlu2 %v1806_v0, %s2296_s10 }
 0x4ee   : > { %v1808_v2 = vpop.f32.mrf.mxu2 }
 0x4ef   : > { %v1809_v18 = vadd.f32 %v2217_v14, %v1808_v2 }
 0x4f1   : > { %1837 = vrot.lane.b32.xlu1 %v1809_v18, %s2296_s10 }
 0x4f6   : > { %v1811_v7 = vpop.f32.mrf.mxu2 }
 0x4f7   : > { %v1812_v20 = vadd.f32 %v2217_v14, %v1811_v7 }
 0x4f9   : > { %1839 = vrot.lane.b32.xlu0 %v1812_v20, %s2296_s10 }
 0x4fe   : > { %v1814_v13 = vpop.f32.mrf.mxu2 }
 0x4ff   : > { %v1815_v59 = vadd.f32 %v2217_v14, %v1814_v13 }
 0x501   : > { %1841 = vrot.lane.b32.xlu2 %v1815_v59, %s2296_s10 }
 0x51d   : > { %v1832_v5 = vpop.permute.xlu1 %1831 }
 0x51e   : > { %v1855_v12 = vsel %vm338_vm1, %v1063_v63, %v1832_v5 }
 0x51f   : > { %1864 = vst.msk [vmem:[%s2955_s13] sm:$0xff] %vm1863_vm4, %v1855_v12 }
 0x524   : > { %v1817_v45 = vpop.f32.mrf.mxu2 }
 0x525   : > { %v1818_v15 = vadd.f32 %v2217_v14, %v1817_v45 }
 0x527   : > { %1843 = vrot.lane.b32.xlu1 %v1818_v15, %s2296_s10 }
 0x52f   : > { %v1820_v61 = vpop.f32.mrf.mxu2 }
 0x530   : > { %v1821_v9 = vadd.f32 %v2217_v14, %v1820_v61 }
 0x532   : > { %1845 = vrot.lane.b32.xlu0 %v1821_v9, %s2296_s10 }
 0x543   : > { %v1836_v38 = vpop.permute.xlu2 %1835 }
 0x544   : > { %v1857_v60 = vsel %vm338_vm1, %v1065_v28, %v1836_v38 }
 0x545   : > { %1866 = vst.msk [vmem:[%s2955_s13 + $0x10] sm:$0xff] %vm1863_vm4, %v1857_v60 }
 0x553   : > { %v1834_v43 = vpop.permute.xlu0 %1833 }
 0x554   : > { %v1856_v40 = vsel %vm338_vm1, %v1064_v4, %v1834_v43 }
 0x555   : > { %1865 = vst.msk [vmem:[%s2955_s13 + $0x8] sm:$0xff] %vm1863_vm4, %v1856_v40 }
 0x55b   : > { %v1842_v1 = vpop.permute.xlu2 %1841 }
 0x55c   : > { %v1860_v53 = vsel %vm338_vm1, %v2636_v11, %v1842_v1 }
 0x55d   : > { %1869 = vst.msk [vmem:[%s2955_s13 + $0x28] sm:$0xff] %vm1863_vm4, %v1860_v53 }
 0x563   : > { %v1838_v34 = vpop.permute.xlu1 %1837 }
 0x564   : > { %v1858_v29 = vsel %vm338_vm1, %v2649_v55, %v1838_v34 }
 0x565   : > { %1867 = vst.msk [vmem:[%s2955_s13 + $0x18] sm:$0xff] %vm1863_vm4, %v1858_v29 }
 0x56b   : > { %v1840_v36 = vpop.permute.xlu0 %1839 }
 0x56c   : > { %v1859_v62 = vsel %vm338_vm1, %v2624_v42, %v1840_v36 }
 0x56d   : > { %1868 = vst.msk [vmem:[%s2955_s13 + $0x20] sm:$0xff] %vm1863_vm4, %v1859_v62 }
 0x599   : > { %v1844_v6 = vpop.permute.xlu1 %1843 }
 0x59a   : > { %v1861_v26 = vsel %vm338_vm1, %v2646_v41, %v1844_v6 }
 0x59b   : > { %1870 = vst.msk [vmem:[%s2955_s13 + $0x30] sm:$0xff] %vm1863_vm4, %v1861_v26 }
 0x5a4   : > { %v1846_v11 = vpop.permute.xlu0 %1845 }
 0x5a5   : > { %v1862_v33 = vsel %vm338_vm1, %v2663_v24, %v1846_v11 }
 0x5a6   : > { %1871 = vst.msk [vmem:[%s2955_s13 + $0x38] sm:$0xff] %vm1863_vm4, %v1862_v33 }
 0x5a7 PF: > { %s18_s27 = sadd.s32 1, %s2288_s27  }
 0x5a8   : > { %p15_p4 = scmp.ge.s32.totalorder %s18_s27, 4  }
 0x5aa   :  { %17 = sbr.rel (!%p15_p4) target bundleno = 1 (0x1), region = 95 }

</bundles_post_ra>
